<compile_context>
chip_gen: v7x
topology: tpu7x:2x2x1
jax: 0.10.0
libtpu: 0.0.40
codegen_flags: <defaults>
</compile_context>

<pallas_src>
import jax
import jax.numpy as jnp
from jax.experimental import pallas as pl
from jax.experimental.pallas import tpu as pltpu


def _round_up(x, m):
    return (x + m - 1) // m * m


# ------------------------------ fused kernel ------------------------------- #

def _fused_kernel(x_ref, w_ref, shift_ref, wfc_ref, bfc_ref, o_ref):
    """Whole network for one batch element.

    x_ref:     (1, Mp, Kp)  bf16  full-im2col rows, row m = h*W + w, K axis = tap*C_in
    w_ref:     (Kp, Cp)     bf16  im2col conv weight (BN scale folded, zero-padded)
    shift_ref: (1, Cp)      f32   BN shift + conv bias (0 in padded channels)
    wfc_ref:   (N, Mp, Cp)  f32   FC weight scattered into the conv-output row layout
    bfc_ref:   (N, 1)       f32   FC bias
    o_ref:     (1, N, 1)    f32   output logits (column)
    """
    n_out = wfc_ref.shape[0]

    # ---- 3x3 "same" conv == ONE MXU GEMM over im2col rows; f32 accumulation in vregs ----
    y = jnp.dot(x_ref[0], w_ref[...], preferred_element_type=jnp.float32)   # (Mp, Cp)

    # ---- fused BatchNorm shift + ReLU (scale already folded into w_ref) ----
    y = jnp.maximum(y + shift_ref[...], 0.0)

    # ---- Flatten + Linear(., N): f32 VPU multiply + stacked reductions ----
    # padded rows / channels contribute 0 because the corresponding wfc entries are 0.
    parts = [jnp.sum(y * wfc_ref[n], axis=0, keepdims=True)                 # N x (1, Cp)
             for n in range(n_out)]
    col = jnp.sum(jnp.concatenate(parts, axis=0), axis=1, keepdims=True)    # (N, 1)
    o_ref[0] = col + bfc_ref[...]


# -------------------------------- wrapper ----------------------------------- #

def conv2net_forward(x, params):
    """x: (B, 132, 10, 10) float32 -> (B, 4) float32."""
    B, C_in, H, W = x.shape
    w_conv, b_conv = params["w_conv"], params["b_conv"]
    gamma, beta = params["gamma"], params["beta"]
    mean, var = params["mean"], params["var"]
    w_fc, b_fc = params["w_fc"], params["b_fc"]
    eps = 1e-5

    C_out = w_conv.shape[0]
    N_out = w_fc.shape[0]
    Cp = _round_up(C_out, 128)          # 200 -> 256 lane-dense output channels
    K = 9 * C_in                        # full im2col contraction: 1188
    Kp = _round_up(K, 128)              # 1188 -> 1280 lane-dense K
    M = H * W                           # 100 conv-output rows, row m = h*W + w
    Mp = _round_up(M, 16)               # 100 -> 112 (bf16 sublane pack)

    # ---- weight prep (trace-time constant folding) ----
    scale = gamma * jax.lax.rsqrt(var + eps)                           # BN scale
    shift = beta + (b_conv - mean) * scale                             # BN shift + conv bias
    shift_p = jnp.pad(shift, (0, Cp - C_out)).reshape(1, Cp).astype(jnp.float32)

    # im2col conv weight with BN scale folded in: (C_out,C_in,3,3) -> (9*C_in, C_out), padded
    wk = (w_conv * scale[:, None, None, None]).transpose(2, 3, 1, 0)   # (3,3,C_in,C_out)
    wk = wk.reshape(K, C_out)
    wk = jnp.pad(wk, ((0, Kp - K), (0, Cp - C_out))).astype(jnp.bfloat16)

    # FC weight: (n, C*H*W) -> (n, H*W, C) matching the conv-output row layout; f32, padded
    wfc = w_fc.reshape(N_out, C_out, H, W).transpose(0, 2, 3, 1)       # (n, H, W, C)
    wfc = wfc.reshape(N_out, M, C_out)
    wfc = jnp.pad(wfc, ((0, 0), (0, Mp - M), (0, Cp - C_out))).astype(jnp.float32)

    bfc = b_fc.reshape(N_out, 1).astype(jnp.float32)

    # ---- runtime input prep: full im2col (B, M, 9*C_in), ~286 KB/image in bf16 ----
    x_nhwc = jnp.transpose(x, (0, 2, 3, 1))                            # (B, H, W, C_in)
    x_pad = jnp.pad(x_nhwc, ((0, 0), (1, 1), (1, 1), (0, 0)))          # (B, H+2, W+2, C_in)
    taps = [x_pad[:, kh:kh + H, kw:kw + W, :]
            for kh in range(3) for kw in range(3)]                     # order matches wk
    x_col = jnp.concatenate(taps, axis=-1).reshape(B, M, K)            # (B, M, 9*C_in)
    x_col = jnp.pad(x_col, ((0, 0), (0, Mp - M), (0, Kp - K))).astype(jnp.bfloat16)

    out = pl.pallas_call(
        _fused_kernel,
        out_shape=jax.ShapeDtypeStruct((B, N_out, 1), jnp.float32),
        grid=(B,),
        in_specs=[
            pl.BlockSpec((1, Mp, Kp), lambda b: (b, 0, 0)),        # im2col rows (per image)
            pl.BlockSpec((Kp, Cp), lambda b: (0, 0)),              # conv weight (resident)
            pl.BlockSpec((1, Cp), lambda b: (0, 0)),               # BN shift
            pl.BlockSpec((N_out, Mp, Cp), lambda b: (0, 0, 0)),    # FC weight (resident, f32)
            pl.BlockSpec((N_out, 1), lambda b: (0, 0)),            # FC bias
        ],
        out_specs=pl.BlockSpec((1, N_out, 1), lambda b: (b, 0, 0)),
        compiler_params=pltpu.CompilerParams(dimension_semantics=("parallel",)),
    )(x_col, wk, shift_p, wfc, bfc)
    return out.reshape(B, N_out)


# ------------------------------ params / reference -------------------------- #

def make_params(key):
    ks = jax.random.split(key, 8)
    C_in, C_out, HW, N = 132, 200, 100, 4
    return {
        "w_conv": 0.05 * jax.random.normal(ks[0], (C_out, C_in, 3, 3), jnp.float32),
        "b_conv": 0.05 * jax.random.normal(ks[1], (C_out,), jnp.float32),
        "gamma": 1.0 + 0.1 * jax.random.normal(ks[2], (C_out,), jnp.float32),
        "beta": 0.1 * jax.random.normal(ks[3], (C_out,), jnp.float32),
        "mean": 0.1 * jax.random.normal(ks[4], (C_out,), jnp.float32),
        "var": jnp.abs(1.0 + 0.1 * jax.random.normal(ks[5], (C_out,), jnp.float32)),
        "w_fc": 0.01 * jax.random.normal(ks[6], (N, C_out * HW), jnp.float32),
        "b_fc": 0.01 * jax.random.normal(ks[7], (N,), jnp.float32),
    }


def reference_forward(x, params):
    """Pure-JAX f32 reference (lax.conv) for correctness check."""
    eps = 1e-5
    y = jax.lax.conv_general_dilated(
        x, params["w_conv"], window_strides=(1, 1), padding="SAME",
        dimension_numbers=("NCHW", "OIHW", "NCHW"),
    ) + params["b_conv"][None, :, None, None]
    s = params["gamma"] / jnp.sqrt(params["var"] + eps)
    y = (y - params["mean"][None, :, None, None]) * s[None, :, None, None] \
        + params["beta"][None, :, None, None]
    y = jnp.maximum(y, 0.0)
    y = y.reshape(y.shape[0], -1)
    return y @ params["w_fc"].T + params["b_fc"]


if __name__ == "__main__":
    key = jax.random.PRNGKey(0)
    kx, kp = jax.random.split(key)

    # Linear(20000, 4) with 200 channels forces spatial 10x10.
    B = 2
    x = jax.random.normal(kx, (B, 132, 10, 10), jnp.float32)
    params = make_params(kp)

    fwd = jax.jit(conv2net_forward)
    out = jax.block_until_ready(fwd(x, params))

    ref = reference_forward(x, params)
    assert out.shape == (B, 4)
    # Tolerance accounts for bf16 MXU operands (f32 accumulation); a layout/indexing bug
    # would produce O(0.1-1) errors, far above this.
    assert jnp.allclose(out, ref, rtol=2e-2, atol=2e-2), "mismatch vs JAX reference"

    print("KERNEL_OK")
</pallas_src>

<mosaic_0001>
module attributes {stable_mosaic.version = 11 : i64} {
  func.func @_fused_kernel(%arg0: i32, %arg1: memref<1x112x1280xbf16, #tpu.memory_space<vmem>>, %arg2: memref<1280x256xbf16, #tpu.memory_space<vmem>>, %arg3: memref<1x256xf32, #tpu.memory_space<vmem>>, %arg4: memref<4x112x256xf32, #tpu.memory_space<vmem>>, %arg5: memref<4x1xf32, #tpu.memory_space<vmem>>, %arg6: memref<1x4x1xf32, #tpu.memory_space<vmem>>) attributes {dimension_semantics = [#tpu.dimension_semantics<parallel>], iteration_bounds = array<i64: 2>, scalar_prefetch = 0 : i64, scratch_operands = 0 : i64, tpu.core_type = #tpu.core_type<tc>, window_params = [{transform_indices = @transform_0, window_bounds = array<i64: 1, 112, 1280>}, {pipeline_mode = #tpu.pipeline_mode<synchronous>, transform_indices = @transform_1, window_bounds = array<i64: 1280, 256>}, {pipeline_mode = #tpu.pipeline_mode<synchronous>, transform_indices = @transform_2, window_bounds = array<i64: 1, 256>}, {pipeline_mode = #tpu.pipeline_mode<synchronous>, transform_indices = @transform_3, window_bounds = array<i64: 4, 112, 256>}, {pipeline_mode = #tpu.pipeline_mode<synchronous>, transform_indices = @transform_4, window_bounds = array<i64: 4, 1>}, {transform_indices = @transform_5, window_bounds = array<i64: 1, 4, 1>}]} {
    %c0 = arith.constant 0 : index
    %c0_0 = arith.constant 0 : index
    %c0_1 = arith.constant 0 : index
    %0 = vector.load %arg1[%c0, %c0_0, %c0_1] : memref<1x112x1280xbf16, #tpu.memory_space<vmem>>, vector<1x112x1280xbf16>
    %1 = vector.shape_cast %0 : vector<1x112x1280xbf16> to vector<112x1280xbf16>
    %c0_2 = arith.constant 0 : index
    %c0_3 = arith.constant 0 : index
    %2 = vector.load %arg2[%c0_2, %c0_3] : memref<1280x256xbf16, #tpu.memory_space<vmem>>, vector<1280x256xbf16>
    %cst = arith.constant dense<0.000000e+00> : vector<112x256xf32>
    %3 = tpu.matmul %1, %2, %cst {dimension_numbers = #tpu.dot_dimension_numbers<[1], [0], [0], [1], [0, 0, 1, 1], [], []>} : vector<112x1280xbf16>, vector<1280x256xbf16>, vector<112x256xf32> -> vector<112x256xf32>
    %c0_4 = arith.constant 0 : index
    %c0_5 = arith.constant 0 : index
    %4 = vector.load %arg3[%c0_4, %c0_5] : memref<1x256xf32, #tpu.memory_space<vmem>>, vector<1x256xf32>
    %5 = vector.broadcast %4 : vector<1x256xf32> to vector<112x256xf32>
    %6 = arith.addf %3, %5 : vector<112x256xf32>
    %cst_6 = arith.constant 0.000000e+00 : f32
    %7 = vector.broadcast %cst_6 : f32 to vector<112x256xf32>
    %8 = arith.maximumf %6, %7 : vector<112x256xf32>
    %c0_7 = arith.constant 0 : index
    %c0_8 = arith.constant 0 : index
    %c0_9 = arith.constant 0 : index
    %9 = vector.load %arg4[%c0_7, %c0_8, %c0_9] : memref<4x112x256xf32, #tpu.memory_space<vmem>>, vector<1x112x256xf32>
    %10 = vector.shape_cast %9 : vector<1x112x256xf32> to vector<112x256xf32>
    %11 = arith.mulf %8, %10 : vector<112x256xf32>
    %cst_10 = arith.constant dense<0.000000e+00> : vector<256xf32>
    %12 = vector.multi_reduction <add>, %11, %cst_10 [0] : vector<112x256xf32> to vector<256xf32>
    %13 = vector.shape_cast %12 : vector<256xf32> to vector<1x256xf32>
    %c1 = arith.constant 1 : index
    %c0_11 = arith.constant 0 : index
    %c0_12 = arith.constant 0 : index
    %14 = vector.load %arg4[%c1, %c0_11, %c0_12] : memref<4x112x256xf32, #tpu.memory_space<vmem>>, vector<1x112x256xf32>
    %15 = vector.shape_cast %14 : vector<1x112x256xf32> to vector<112x256xf32>
    %16 = arith.mulf %8, %15 : vector<112x256xf32>
    %cst_13 = arith.constant dense<0.000000e+00> : vector<256xf32>
    %17 = vector.multi_reduction <add>, %16, %cst_13 [0] : vector<112x256xf32> to vector<256xf32>
    %18 = vector.shape_cast %17 : vector<256xf32> to vector<1x256xf32>
    %c2 = arith.constant 2 : index
    %c0_14 = arith.constant 0 : index
    %c0_15 = arith.constant 0 : index
    %19 = vector.load %arg4[%c2, %c0_14, %c0_15] : memref<4x112x256xf32, #tpu.memory_space<vmem>>, vector<1x112x256xf32>
    %20 = vector.shape_cast %19 : vector<1x112x256xf32> to vector<112x256xf32>
    %21 = arith.mulf %8, %20 : vector<112x256xf32>
    %cst_16 = arith.constant dense<0.000000e+00> : vector<256xf32>
    %22 = vector.multi_reduction <add>, %21, %cst_16 [0] : vector<112x256xf32> to vector<256xf32>
    %23 = vector.shape_cast %22 : vector<256xf32> to vector<1x256xf32>
    %c3 = arith.constant 3 : index
    %c0_17 = arith.constant 0 : index
    %c0_18 = arith.constant 0 : index
    %24 = vector.load %arg4[%c3, %c0_17, %c0_18] : memref<4x112x256xf32, #tpu.memory_space<vmem>>, vector<1x112x256xf32>
    %25 = vector.shape_cast %24 : vector<1x112x256xf32> to vector<112x256xf32>
    %26 = arith.mulf %8, %25 : vector<112x256xf32>
    %cst_19 = arith.constant dense<0.000000e+00> : vector<256xf32>
    %27 = vector.multi_reduction <add>, %26, %cst_19 [0] : vector<112x256xf32> to vector<256xf32>
    %28 = vector.shape_cast %27 : vector<256xf32> to vector<1x256xf32>
    %29 = tpu.concatenate %13, %18, %23, %28 in 0 : vector<1x256xf32>, vector<1x256xf32>, vector<1x256xf32>, vector<1x256xf32> -> vector<4x256xf32>
    %cst_20 = arith.constant dense<0.000000e+00> : vector<4xf32>
    %30 = vector.multi_reduction <add>, %29, %cst_20 [1] : vector<4x256xf32> to vector<4xf32>
    %31 = vector.shape_cast %30 : vector<4xf32> to vector<4x1xf32>
    %c0_21 = arith.constant 0 : index
    %c0_22 = arith.constant 0 : index
    %32 = vector.load %arg5[%c0_21, %c0_22] : memref<4x1xf32, #tpu.memory_space<vmem>>, vector<4x1xf32>
    %33 = arith.addf %31, %32 : vector<4x1xf32>
    %c0_23 = arith.constant 0 : index
    %c0_24 = arith.constant 0 : index
    %c0_25 = arith.constant 0 : index
    %34 = vector.load %arg6[%c0_23, %c0_24, %c0_25] : memref<1x4x1xf32, #tpu.memory_space<vmem>>, vector<1x4x1xf32>
    %35 = vector.shape_cast %34 : vector<1x4x1xf32> to vector<4x1xf32>
    %36 = vector.shape_cast %33 : vector<4x1xf32> to vector<1x4x1xf32>
    tpu.vector_store %arg6[%c0_23, %c0_24, %c0_25], %36 {strides = array<i32>} : memref<1x4x1xf32, #tpu.memory_space<vmem>>, vector<1x4x1xf32>,
    return
  }
  func.func @transform_0(%arg0: i32) -> (i32, i32, i32) {
    %c0_i32 = arith.constant 0 : i32
    %c0_i32_0 = arith.constant 0 : i32
    %c0_i32_1 = arith.constant 0 : i32
    return %arg0, %c0_i32, %c0_i32_0 : i32, i32, i32
  }
  func.func @transform_1(%arg0: i32) -> (i32, i32) {
    %c0_i32 = arith.constant 0 : i32
    %c0_i32_0 = arith.constant 0 : i32
    %c0_i32_1 = arith.constant 0 : i32
    return %c0_i32, %c0_i32_0 : i32, i32
  }
  func.func @transform_2(%arg0: i32) -> (i32, i32) {
    %c0_i32 = arith.constant 0 : i32
    %c0_i32_0 = arith.constant 0 : i32
    %c0_i32_1 = arith.constant 0 : i32
    return %c0_i32, %c0_i32_0 : i32, i32
  }
  func.func @transform_3(%arg0: i32) -> (i32, i32, i32) {
    %c0_i32 = arith.constant 0 : i32
    %c0_i32_0 = arith.constant 0 : i32
    %c0_i32_1 = arith.constant 0 : i32
    %c0_i32_2 = arith.constant 0 : i32
    return %c0_i32, %c0_i32_0, %c0_i32_1 : i32, i32, i32
  }
  func.func @transform_4(%arg0: i32) -> (i32, i32) {
    %c0_i32 = arith.constant 0 : i32
    %c0_i32_0 = arith.constant 0 : i32
    %c0_i32_1 = arith.constant 0 : i32
    return %c0_i32, %c0_i32_0 : i32, i32
  }
  func.func @transform_5(%arg0: i32) -> (i32, i32, i32) {
    %c0_i32 = arith.constant 0 : i32
    %c0_i32_0 = arith.constant 0 : i32
    %c0_i32_1 = arith.constant 0 : i32
    return %arg0, %c0_i32, %c0_i32_0 : i32, i32, i32
  }
}

</mosaic_0001>

<bundles_post_ra>
// kernel: conv2net_forward.1
= control target key start
LH: loop header
LB: loop body
LE: loop exit
PB: predicated region body
PF: predicated region fallthrough
CT: control target
= control target key end

     0   :  { %s3496_s18 = smov 0   ;;  %s4746_s0 = inlined_call_operand.vmem [shape: bf16[2,112,1280], index: 0, kind: input, shape index: {}]   ;;  %s4747_s1 = inlined_call_operand.vmem [shape: bf16[1280,256], index: 1, kind: input, shape index: {}]   ;;  %s4748_s2 = inlined_call_operand.vmem [shape: f32[1,256], index: 2, kind: input, shape index: {}]   ;;  %s4749_s3 = inlined_call_operand.vmem [shape: f32[4,112,256], index: 3, kind: input, shape index: {}]   ;;  %s4750_s4 = inlined_call_operand.vmem [shape: f32[4,1], index: 4, kind: input, shape index: {}]   ;;  %s4751_s5 = inlined_call_operand.vmem [shape: f32[2,4,1], index: 5, kind: output, shape index: {}]  }
   0x1 LB: > { %s2609_s19 = sadd.s32 4294967295, %s3464_s18   ;;  %p2613_p0 = scmp.ge.s32.totalorder %s3464_s18, 1  ;;  %s3464_s18 = sphi %s3496_s18, %s15_s18  }
   0x2   : > { %p187_p1 = scmp.lt.s32.totalorder %s3464_s18, 3 }
   0x4   : > { %p188_p2 = pnand %p2613_p0, %p187_p1 }
   0x6   : > { %191 = sbr.rel (%p188_p2) target bundleno = 652 (0x28c), region = 40 }
   0xd   : > { %v3113_v0 = vld [vmem:[%s4747_s1 + $0x4] ss:$8 sps:$4 sm:$0xff]   ;;  %v3117_v2 = vld [vmem:[%s4747_s1] ss:$8 sps:$4 sm:$0xff]   ;;  %v3119_v4 = vld [vmem:[%s4747_s1 + $0x14] ss:$8 sps:$4 sm:$0xff]  }
   0xe   : > { %v3115_v1 = vld [vmem:[%s4747_s1 + $0x204] ss:$8 sps:$4 sm:$0xff]   ;;  %1615 = vmatprep.subr.bf16.mxu1 %v3113_v0  ;;  %v3118_v3 = vld [vmem:[%s4747_s1 + $0x200] ss:$8 sps:$4 sm:$0xff]   ;;  %v3121_v5 = vld [vmem:[%s4747_s1 + $0x214] ss:$8 sps:$4 sm:$0xff]  }
   0xf   : > { %1821 = vmatprep.subr.bf16.mxu0 %v3115_v1  ;;  %1616 = vmatpush1.bf16.msra.mxu1 %v3117_v2  ;;  %v3123_v6 = vld [vmem:[%s4747_s1 + $0x10] ss:$8 sps:$4 sm:$0xff]   ;;  %v3125_v8 = vld [vmem:[%s4747_s1 + $0x24] ss:$8 sps:$4 sm:$0xff]   ;;  %v3129_v10 = vld [vmem:[%s4747_s1 + $0x20] ss:$8 sps:$4 sm:$0xff]  }
  0x10   : > { %1822 = vmatpush1.bf16.msra.mxu0 %v3118_v3  ;;  %1617 = vmatprep.subr.bf16.mxu1 %v3119_v4  ;;  %v3124_v7 = vld [vmem:[%s4747_s1 + $0x210] ss:$8 sps:$4 sm:$0xff]   ;;  %v3127_v9 = vld [vmem:[%s4747_s1 + $0x224] ss:$8 sps:$4 sm:$0xff]   ;;  %v3130_v11 = vld [vmem:[%s4747_s1 + $0x220] ss:$8 sps:$4 sm:$0xff]  }
  0x11   : > { %1823 = vmatprep.subr.bf16.mxu0 %v3121_v5  ;;  %v3131_v12 = vld [vmem:[%s4747_s1 + $0x34] ss:$8 sps:$4 sm:$0xff]   ;;  %v3135_v14 = vld [vmem:[%s4747_s1 + $0x30] ss:$8 sps:$4 sm:$0xff]   ;;  %v3137_v16 = vld [vmem:[%s4747_s1 + $0x44] ss:$8 sps:$4 sm:$0xff]  }
  0x12   : > { %v3133_v13 = vld [vmem:[%s4747_s1 + $0x234] ss:$8 sps:$4 sm:$0xff]   ;;  %v3136_v15 = vld [vmem:[%s4747_s1 + $0x230] ss:$8 sps:$4 sm:$0xff]   ;;  %v3139_v17 = vld [vmem:[%s4747_s1 + $0x244] ss:$8 sps:$4 sm:$0xff]  }
  0x13   : > { %1618 = vmatpush1.bf16.msra.mxu1 %v3123_v6  ;;  %v3141_v18 = vld [vmem:[%s4747_s1 + $0x40] ss:$8 sps:$4 sm:$0xff]   ;;  %v3143_v20 = vld [vmem:[%s4747_s1 + $0x54] ss:$8 sps:$4 sm:$0xff]   ;;  %v3147_v22 = vld [vmem:[%s4747_s1 + $0x50] ss:$8 sps:$4 sm:$0xff]  }
  0x14   : > { %1824 = vmatpush1.bf16.msra.mxu0 %v3124_v7  ;;  %1619 = vmatprep.subr.bf16.mxu1 %v3125_v8  ;;  %v3142_v19 = vld [vmem:[%s4747_s1 + $0x240] ss:$8 sps:$4 sm:$0xff]   ;;  %v3145_v21 = vld [vmem:[%s4747_s1 + $0x254] ss:$8 sps:$4 sm:$0xff]   ;;  %v3148_v23 = vld [vmem:[%s4747_s1 + $0x250] ss:$8 sps:$4 sm:$0xff]  }
  0x15   : > { %1825 = vmatprep.subr.bf16.mxu0 %v3127_v9  ;;  %v3149_v24 = vld [vmem:[%s4747_s1 + $0x64] ss:$8 sps:$4 sm:$0xff]   ;;  %v3153_v26 = vld [vmem:[%s4747_s1 + $0x60] ss:$8 sps:$4 sm:$0xff]   ;;  %v3155_v28 = vld [vmem:[%s4747_s1 + $0x74] ss:$8 sps:$4 sm:$0xff]  }
  0x16   : > { %v3151_v25 = vld [vmem:[%s4747_s1 + $0x264] ss:$8 sps:$4 sm:$0xff]   ;;  %v3154_v27 = vld [vmem:[%s4747_s1 + $0x260] ss:$8 sps:$4 sm:$0xff]   ;;  %v3157_v29 = vld [vmem:[%s4747_s1 + $0x274] ss:$8 sps:$4 sm:$0xff]  }
  0x17   : > { %1620 = vmatpush1.bf16.msra.mxu1 %v3129_v10  ;;  %v3159_v30 = vld [vmem:[%s4747_s1 + $0x70] ss:$8 sps:$4 sm:$0xff]   ;;  %v3161_v32 = vld [vmem:[%s4747_s1 + $0x84] ss:$8 sps:$4 sm:$0xff]   ;;  %p214_p3 = scmp.lt.s32.totalorder %s2609_s19, 1  ;;  %vm2537_vm0 = vcmask 1040384  }
  0x18   : > { %1826 = vmatpush1.bf16.msra.mxu0 %v3130_v11  ;;  %1621 = vmatprep.subr.bf16.mxu1 %v3131_v12  ;;  %v3160_v31 = vld [vmem:[%s4747_s1 + $0x270] ss:$8 sps:$4 sm:$0xff]   ;;  %v3163_v33 = vld [vmem:[%s4747_s1 + $0x284] ss:$8 sps:$4 sm:$0xff]   ;;  %v3165_v34 = vld [vmem:[%s4747_s1 + $0x80] ss:$8 sps:$4 sm:$0xff]  }
  0x19   : > { %1827 = vmatprep.subr.bf16.mxu0 %v3133_v13  ;;  %v3166_v35 = vld [vmem:[%s4747_s1 + $0x280] ss:$8 sps:$4 sm:$0xff]   ;;  %v3167_v36 = vld [vmem:[%s4747_s1 + $0x94] ss:$8 sps:$4 sm:$0xff]   ;;  %s4805_s19 = smov (!%p214_p3, %s2609_s19), 1  ;;  %vm2540_vm1 = vcmask 1041408  }
  0x1a   : > { %v3169_v37 = vld [vmem:[%s4747_s1 + $0x294] ss:$8 sps:$4 sm:$0xff]   ;;  %v3171_v38 = vld [vmem:[%s4747_s1 + $0x90] ss:$8 sps:$4 sm:$0xff]   ;;  %v3173_v40 = vld [vmem:[%s4747_s1 + $0xa4] ss:$8 sps:$4 sm:$0xff]  }
  0x1b   : > { %1622 = vmatpush1.bf16.msra.mxu1 %v3135_v14  ;;  %v3172_v39 = vld [vmem:[%s4747_s1 + $0x290] ss:$8 sps:$4 sm:$0xff]   ;;  %s3104_s8 = smul.u32 560, %s4805_s19  ;;  %v3175_v41 = vld [vmem:[%s4747_s1 + $0x2a4] ss:$8 sps:$4 sm:$0xff]   ;;  %vm2543_vm2 = vcmask 1042432  }
  0x1c   : > { %1828 = vmatpush1.bf16.msra.mxu0 %v3136_v15  ;;  %1623 = vmatprep.subr.bf16.mxu1 %v3137_v16  ;;  %v3177_v42 = vld [vmem:[%s4747_s1 + $0xa0] ss:$8 sps:$4 sm:$0xff]   ;;  %v3179_v44 = vld [vmem:[%s4747_s1 + $0xb4] ss:$8 sps:$4 sm:$0xff]   ;;  %v3183_v46 = vld [vmem:[%s4747_s1 + $0xb0] ss:$8 sps:$4 sm:$0xff]  }
  0x1d   : > { %1829 = vmatprep.subr.bf16.mxu0 %v3139_v17  ;;  %v3178_v43 = vld [vmem:[%s4747_s1 + $0x2a0] ss:$8 sps:$4 sm:$0xff]   ;;  %s3649_s21 = scalar_lea.vmem %s4746_s0, %s3104_s8  ;;  %v3181_v45 = vld [vmem:[%s4747_s1 + $0x2b4] ss:$8 sps:$4 sm:$0xff]   ;;  %v3184_v47 = vld [vmem:[%s4747_s1 + $0x2b0] ss:$8 sps:$4 sm:$0xff]  }
  0x1e   : > { %v3211_v48 = vld [vmem:[%s3649_s21 + $0x4] ss:$40 sps:$4 sm:$0xff]   ;;  %v3217_v51 = vld [vmem:[%s3649_s21 + $0x14] ss:$40 sps:$4 sm:$0xff]   ;;  %v3189_v52 = vld [vmem:[%s4747_s1 + $0xc0] ss:$8 sps:$4 sm:$0xff]  }
  0x1f   : > { %1624 = vmatpush1.bf16.msra.mxu1 %v3141_v18  ;;  %v3185_v49 = vld [vmem:[%s4747_s1 + $0xc4] ss:$8 sps:$4 sm:$0xff]   ;;  %1647 = vmatprep.mubr.bf16.mxu1 %v3211_v48  ;;  %v3190_v53 = vld [vmem:[%s4747_s1 + $0x2c0] ss:$8 sps:$4 sm:$0xff]   ;;  %v3191_v54 = vld [vmem:[%s4747_s1 + $0xd4] ss:$8 sps:$4 sm:$0xff]  }
  0x20   : > { %1830 = vmatpush1.bf16.msra.mxu0 %v3142_v19  ;;  %1625 = vmatprep.subr.bf16.mxu1 %v3143_v20  ;;  %v3187_v50 = vld [vmem:[%s4747_s1 + $0x2c4] ss:$8 sps:$4 sm:$0xff]   ;;  %v3193_v55 = vld [vmem:[%s4747_s1 + $0x2d4] ss:$8 sps:$4 sm:$0xff]   ;;  %v3195_v56 = vld [vmem:[%s4747_s1 + $0xd0] ss:$8 sps:$4 sm:$0xff]  }
  0x21   : > { %1831 = vmatprep.subr.bf16.mxu0 %v3145_v21  ;;  %1853 = vmatprep.mubr.bf16.mxu0 %v3217_v51  ;;  %v3196_v57 = vld [vmem:[%s4747_s1 + $0x2d0] ss:$8 sps:$4 sm:$0xff]   ;;  %v3197_v58 = vld [vmem:[%s4747_s1 + $0xe4] ss:$8 sps:$4 sm:$0xff]   ;;  %v3201_v60 = vld [vmem:[%s4747_s1 + $0xe0] ss:$8 sps:$4 sm:$0xff]  }
  0x22   : > { %v3199_v59 = vld [vmem:[%s4747_s1 + $0x2e4] ss:$8 sps:$4 sm:$0xff]   ;;  %v3202_v61 = vld [vmem:[%s4747_s1 + $0x2e0] ss:$8 sps:$4 sm:$0xff]   ;;  %v3203_v62 = vld [vmem:[%s4747_s1 + $0xf4] ss:$8 sps:$4 sm:$0xff]  }
  0x23   : > { %1626 = vmatpush1.bf16.msra.mxu1 %v3147_v22  ;;  %v3205_v63 = vld [vmem:[%s4747_s1 + $0x2f4] ss:$8 sps:$4 sm:$0xff]   ;;  %v3207_v0 = vld [vmem:[%s4747_s1 + $0xf0] ss:$8 sps:$4 sm:$0xff]   ;;  %v3214_v2 = vld [vmem:[%s4747_s1 + $0x104] ss:$8 sps:$4 sm:$0xff]  }
  0x24   : > { %1832 = vmatpush1.bf16.msra.mxu0 %v3148_v23  ;;  %1627 = vmatprep.subr.bf16.mxu1 %v3149_v24  ;;  %v3208_v1 = vld [vmem:[%s4747_s1 + $0x2f0] ss:$8 sps:$4 sm:$0xff]   ;;  %v3209_v3 = vld [vmem:[%s3649_s21] ss:$40 sps:$4 sm:$0xff]   ;;  %v3220_v4 = vld [vmem:[%s4747_s1 + $0x304] ss:$8 sps:$4 sm:$0xff]  }
  0x25   : > { %1833 = vmatprep.subr.bf16.mxu0 %v3151_v25  ;;  %v3212_v5 = vld [vmem:[%s4747_s1 + $0x100] ss:$8 sps:$4 sm:$0xff]   ;;  %v3215_v6 = vld [vmem:[%s3649_s21 + $0x10] ss:$40 sps:$4 sm:$0xff]   ;;  %v3223_v8 = vld [vmem:[%s4747_s1 + $0x114] ss:$8 sps:$4 sm:$0xff]  }
  0x26   : > { %v3218_v7 = vld [vmem:[%s4747_s1 + $0x300] ss:$8 sps:$4 sm:$0xff]   ;;  %v3226_v9 = vld [vmem:[%s4747_s1 + $0x314] ss:$8 sps:$4 sm:$0xff]   ;;  %v3241_v11 = vld [vmem:[%s3649_s21 + $0x64] ss:$40 sps:$4 sm:$0xff]  }
  0x27   : > { %1628 = vmatpush1.bf16.msra.mxu1 %v3153_v26  ;;  %v3239_v10 = vld [vmem:[%s3649_s21 + $0x54] ss:$40 sps:$4 sm:$0xff]   ;;  %v3221_v12 = vld [vmem:[%s4747_s1 + $0x110] ss:$8 sps:$4 sm:$0xff]   ;;  %v3229_v14 = vld [vmem:[%s4747_s1 + $0x124] ss:$8 sps:$4 sm:$0xff]  }
  0x28   : > { %1834 = vmatpush1.bf16.msra.mxu0 %v3154_v27  ;;  %1629 = vmatprep.subr.bf16.mxu1 %v3155_v28  ;;  %v3224_v13 = vld [vmem:[%s4747_s1 + $0x310] ss:$8 sps:$4 sm:$0xff]   ;;  %v3232_v15 = vld [vmem:[%s4747_s1 + $0x324] ss:$8 sps:$4 sm:$0xff]   ;;  %v3227_v16 = vld [vmem:[%s4747_s1 + $0x120] ss:$8 sps:$4 sm:$0xff]  }
  0x29   : > { %1835 = vmatprep.subr.bf16.mxu0 %v3157_v29  ;;  %v3230_v17 = vld [vmem:[%s4747_s1 + $0x320] ss:$8 sps:$4 sm:$0xff]   ;;  %v3235_v18 = vld [vmem:[%s4747_s1 + $0x134] ss:$8 sps:$4 sm:$0xff]   ;;  %v3243_v19 = vld [vmem:[%s3649_s21 + $0x50] ss:$40 sps:$4 sm:$0xff]  }
  0x2a   : > { %v3247_v20 = vld [vmem:[%s3649_s21 + $0x60] ss:$40 sps:$4 sm:$0xff]   ;;  %v3238_v21 = vld [vmem:[%s4747_s1 + $0x334] ss:$8 sps:$4 sm:$0xff]   ;;  %v3257_v22 = vld [vmem:[%s3649_s21 + $0xa4] ss:$40 sps:$4 sm:$0xff]  }
  0x2b   : > { %1630 = vmatpush1.bf16.msra.mxu1 %v3159_v30  ;;  %v3259_v23 = vld [vmem:[%s3649_s21 + $0xb4] ss:$40 sps:$4 sm:$0xff]   ;;  %v3233_v24 = vld [vmem:[%s4747_s1 + $0x130] ss:$8 sps:$4 sm:$0xff]   ;;  %v3246_v26 = vld [vmem:[%s4747_s1 + $0x144] ss:$8 sps:$4 sm:$0xff]  }
  0x2c   : > { %1836 = vmatpush1.bf16.msra.mxu0 %v3160_v31  ;;  %1631 = vmatprep.subr.bf16.mxu1 %v3161_v32  ;;  %v3236_v25 = vld [vmem:[%s4747_s1 + $0x330] ss:$8 sps:$4 sm:$0xff]   ;;  %v3250_v27 = vld [vmem:[%s4747_s1 + $0x344] ss:$8 sps:$4 sm:$0xff]   ;;  %v3244_v28 = vld [vmem:[%s4747_s1 + $0x140] ss:$8 sps:$4 sm:$0xff]  }
  0x2d   : > { %1837 = vmatprep.subr.bf16.mxu0 %v3163_v33  ;;  %v3248_v29 = vld [vmem:[%s4747_s1 + $0x340] ss:$8 sps:$4 sm:$0xff]   ;;  %v3253_v30 = vld [vmem:[%s4747_s1 + $0x154] ss:$8 sps:$4 sm:$0xff]   ;;  %v3265_v32 = vld [vmem:[%s3649_s21 + $0xb0] ss:$40 sps:$4 sm:$0xff]  }
  0x2e   : > { %v3261_v31 = vld [vmem:[%s3649_s21 + $0xa0] ss:$40 sps:$4 sm:$0xff]   ;;  %v3256_v33 = vld [vmem:[%s4747_s1 + $0x354] ss:$8 sps:$4 sm:$0xff]   ;;  %v3269_v48 = vld [vmem:[%s4747_s1 + $0x170] ss:$8 sps:$4 sm:$0xff]  }
  0x2f   : > { %1632 = vmatpush1.bf16.msra.mxu1 %v3165_v34  ;;  %v3275_v34 = vld [vmem:[%s3649_s21 + $0xf4] ss:$40 sps:$4 sm:$0xff]   ;;  %v3286_v51 = vld [vmem:[%s4747_s1 + $0x384] ss:$8 sps:$4 sm:$0xff]   ;;  %vm2546_vm3 = vcmask 1043456   ;;  %s2615_s28 = sshll.u32 %s4805_s19, 2 }
  0x30   : > { %1838 = vmatpush1.bf16.msra.mxu0 %v3166_v35  ;;  %1633 = vmatprep.subr.bf16.mxu1 %v3167_v36  ;;  %v3277_v35 = vld [vmem:[%s3649_s21 + $0x104] ss:$40 sps:$4 sm:$0xff]   ;;  %v3251_v36 = vld [vmem:[%s4747_s1 + $0x150] ss:$8 sps:$4 sm:$0xff]   ;;  %s222_s7 = scalar_lea.vmem %s4751_s5, %s2615_s28  ;;  %vm2554_vm4 = vcmask 3072  }
  0x31   : > { %1839 = vmatprep.subr.bf16.mxu0 %v3169_v37  ;;  %v3254_v37 = vld [vmem:[%s4747_s1 + $0x350] ss:$8 sps:$4 sm:$0xff]  }
  0x33   : > { %1634 = vmatpush1.bf16.msra.mxu1 %v3171_v38  ;;  %v3264_v38 = vld [vmem:[%s4747_s1 + $0x164] ss:$8 sps:$4 sm:$0xff]  }
  0x34   : > { %1840 = vmatpush1.bf16.msra.mxu0 %v3172_v39  ;;  %1635 = vmatprep.subr.bf16.mxu1 %v3173_v40  ;;  %v3268_v39 = vld [vmem:[%s4747_s1 + $0x364] ss:$8 sps:$4 sm:$0xff]   ;;  %v3262_v40 = vld [vmem:[%s4747_s1 + $0x160] ss:$8 sps:$4 sm:$0xff]  }
  0x35   : > { %1841 = vmatprep.subr.bf16.mxu0 %v3175_v41  ;;  %v3266_v41 = vld [vmem:[%s4747_s1 + $0x360] ss:$8 sps:$4 sm:$0xff]  }
  0x37   : > { %1636 = vmatpush1.bf16.msra.mxu1 %v3177_v42  ;;  %v3271_v42 = vld [vmem:[%s4747_s1 + $0x174] ss:$8 sps:$4 sm:$0xff]  }
  0x38   : > { %1842 = vmatpush1.bf16.msra.mxu0 %v3178_v43  ;;  %1637 = vmatprep.subr.bf16.mxu1 %v3179_v44  ;;  %v3279_v43 = vld [vmem:[%s3649_s21 + $0xf0] ss:$40 sps:$4 sm:$0xff]   ;;  %v3283_v44 = vld [vmem:[%s3649_s21 + $0x100] ss:$40 sps:$4 sm:$0xff]  }
  0x39   : > { %1843 = vmatprep.subr.bf16.mxu0 %v3181_v45  ;;  %v3274_v45 = vld [vmem:[%s4747_s1 + $0x374] ss:$8 sps:$4 sm:$0xff]  }
  0x3b   : > { %1638 = vmatpush1.bf16.msra.mxu1 %v3183_v46  ;;  %v3293_v46 = vld [vmem:[%s3649_s21 + $0x144] ss:$40 sps:$4 sm:$0xff]  }
  0x3c   : > { %1844 = vmatpush1.bf16.msra.mxu0 %v3184_v47  ;;  %1639 = vmatprep.subr.bf16.mxu1 %v3185_v49  ;;  %v3295_v47 = vld [vmem:[%s3649_s21 + $0x154] ss:$40 sps:$4 sm:$0xff]   ;;  %v3272_v49 = vld [vmem:[%s4747_s1 + $0x370] ss:$8 sps:$4 sm:$0xff]  }
  0x3d   : > { %1845 = vmatprep.subr.bf16.mxu0 %v3187_v50  ;;  %v3282_v50 = vld [vmem:[%s4747_s1 + $0x184] ss:$8 sps:$4 sm:$0xff]  }
  0x3f   : > { %1640 = vmatpush1.bf16.msra.mxu1 %v3189_v52  ;;  %v3280_v52 = vld [vmem:[%s4747_s1 + $0x180] ss:$8 sps:$4 sm:$0xff]  }
  0x40   : > { %1846 = vmatpush1.bf16.msra.mxu0 %v3190_v53  ;;  %1641 = vmatprep.subr.bf16.mxu1 %v3191_v54  ;;  %v3284_v53 = vld [vmem:[%s4747_s1 + $0x380] ss:$8 sps:$4 sm:$0xff]   ;;  %v3289_v54 = vld [vmem:[%s4747_s1 + $0x194] ss:$8 sps:$4 sm:$0xff]  }
  0x41   : > { %1847 = vmatprep.subr.bf16.mxu0 %v3193_v55  ;;  %v3297_v55 = vld [vmem:[%s3649_s21 + $0x140] ss:$40 sps:$4 sm:$0xff]  }
  0x43   : > { %1642 = vmatpush1.bf16.msra.mxu1 %v3195_v56  ;;  %v3301_v56 = vld [vmem:[%s3649_s21 + $0x150] ss:$40 sps:$4 sm:$0xff]  }
  0x44   : > { %1848 = vmatpush1.bf16.msra.mxu0 %v3196_v57  ;;  %1643 = vmatprep.subr.bf16.mxu1 %v3197_v58  ;;  %v3292_v57 = vld [vmem:[%s4747_s1 + $0x394] ss:$8 sps:$4 sm:$0xff]  }
  0x45   : > { %1849 = vmatprep.subr.bf16.mxu0 %v3199_v59  ;;  %v3311_v58 = vld [vmem:[%s3649_s21 + $0x194] ss:$40 sps:$4 sm:$0xff]   ;;  %v3313_v59 = vld [vmem:[%s3649_s21 + $0x1a4] ss:$40 sps:$4 sm:$0xff]  }
  0x47   : > { %1644 = vmatpush1.bf16.msra.mxu1 %v3201_v60  ;;  %v3287_v60 = vld [vmem:[%s4747_s1 + $0x190] ss:$8 sps:$4 sm:$0xff]  }
  0x48   : > { %1850 = vmatpush1.bf16.msra.mxu0 %v3202_v61  ;;  %1645 = vmatprep.subr.bf16.mxu1 %v3203_v62  ;;  %v3290_v61 = vld [vmem:[%s4747_s1 + $0x390] ss:$8 sps:$4 sm:$0xff]   ;;  %v3300_v62 = vld [vmem:[%s4747_s1 + $0x1a4] ss:$8 sps:$4 sm:$0xff]  }
  0x49   : > { %1851 = vmatprep.subr.bf16.mxu0 %v3205_v63  ;;  %v3304_v63 = vld [vmem:[%s4747_s1 + $0x3a4] ss:$8 sps:$4 sm:$0xff]  }
  0x4b   : > { %1646 = vmatpush1.bf16.msra.mxu1 %v3207_v0  ;;  %v3298_v0 = vld [vmem:[%s4747_s1 + $0x1a0] ss:$8 sps:$4 sm:$0xff]  }
  0x4c   : > { %1852 = vmatpush1.bf16.msra.mxu0 %v3208_v1  ;;  %1718 = vmatprep.subr.bf16.mxu1 %v3214_v2  ;;  %v3302_v1 = vld [vmem:[%s4747_s1 + $0x3a0] ss:$8 sps:$4 sm:$0xff]   ;;  %v3315_v2 = vld [vmem:[%s3649_s21 + $0x190] ss:$40 sps:$4 sm:$0xff]  }
  0x4d   : > { %1924 = vmatprep.subr.bf16.mxu0 %v3220_v4  ;;  %v3307_v4 = vld [vmem:[%s4747_s1 + $0x1b4] ss:$8 sps:$4 sm:$0xff]  }
  0x4e   : > { %1648 = vmatmul.mubr.bf16.vlgmr.msra.gmra.mrb[0].mxu1 %v3209_v3  ;;  %v3319_v3 = vld [vmem:[%s3649_s21 + $0x1a0] ss:$40 sps:$4 sm:$0xff]  }
  0x4f   : > { %1854 = vmatmul.mubr.bf16.vlgmr.msra.gmra.mrb[0].mxu0 %v3215_v6  ;;  %1719 = vmatpush1.bf16.msra.mxu1 %v3212_v5  ;;  %v3310_v5 = vld [vmem:[%s4747_s1 + $0x3b4] ss:$8 sps:$4 sm:$0xff]   ;;  %v3329_v6 = vld [vmem:[%s3649_s21 + $0x1e4] ss:$40 sps:$4 sm:$0xff]  }
  0x50   : > { %1925 = vmatpush1.bf16.msra.mxu0 %v3218_v7  ;;  %1720 = vmatprep.subr.bf16.mxu1 %v3223_v8  ;;  %v3331_v7 = vld [vmem:[%s3649_s21 + $0x1f4] ss:$40 sps:$4 sm:$0xff]   ;;  %v3305_v8 = vld [vmem:[%s4747_s1 + $0x1b0] ss:$8 sps:$4 sm:$0xff]  }
  0x51   : > { %1926 = vmatprep.subr.bf16.mxu0 %v3226_v9  ;;  %1657 = vmatprep.mubr.bf16.mxu1 %v3239_v10  ;;  %v3308_v9 = vld [vmem:[%s4747_s1 + $0x3b0] ss:$8 sps:$4 sm:$0xff]   ;;  %v3318_v10 = vld [vmem:[%s4747_s1 + $0x1c4] ss:$8 sps:$4 sm:$0xff]  }
  0x52   : > { %1863 = vmatprep.mubr.bf16.mxu0 %v3241_v11  ;;  %v3322_v11 = vld [vmem:[%s4747_s1 + $0x3c4] ss:$8 sps:$4 sm:$0xff]  }
  0x53   : > { %1721 = vmatpush1.bf16.msra.mxu1 %v3221_v12  ;;  %v3316_v12 = vld [vmem:[%s4747_s1 + $0x1c0] ss:$8 sps:$4 sm:$0xff]  }
  0x54   : > { %1927 = vmatpush1.bf16.msra.mxu0 %v3224_v13  ;;  %1722 = vmatprep.subr.bf16.mxu1 %v3229_v14  ;;  %v3320_v13 = vld [vmem:[%s4747_s1 + $0x3c0] ss:$8 sps:$4 sm:$0xff]  }
  0x55   : > { %1928 = vmatprep.subr.bf16.mxu0 %v3232_v15  ;;  %v3333_v14 = vld [vmem:[%s3649_s21 + $0x1e0] ss:$40 sps:$4 sm:$0xff]   ;;  %v3337_v15 = vld [vmem:[%s3649_s21 + $0x1f0] ss:$40 sps:$4 sm:$0xff]  }
  0x56   : > { %1658 = vmatmul.mubr.bf16.gmra.mrb[4].mxu1 %v3243_v19  ;;  %v3352_v19 = vld [vmem:[%s3649_s21 + $0x1c] ss:$40 sps:$4 sm:$0xff]  }
  0x57   : > { %1864 = vmatmul.mubr.bf16.gmra.mrb[4].mxu0 %v3247_v20  ;;  %1723 = vmatpush1.bf16.msra.mxu1 %v3227_v16  ;;  %v3325_v16 = vld [vmem:[%s4747_s1 + $0x1d4] ss:$8 sps:$4 sm:$0xff]   ;;  %v3323_v20 = vld [vmem:[%s4747_s1 + $0x1d0] ss:$8 sps:$4 sm:$0xff]  }
  0x58   : > { %1929 = vmatpush1.bf16.msra.mxu0 %v3230_v17  ;;  %1724 = vmatprep.subr.bf16.mxu1 %v3235_v18  ;;  %v3328_v17 = vld [vmem:[%s4747_s1 + $0x3d4] ss:$8 sps:$4 sm:$0xff]  }
  0x59   : > { %1930 = vmatprep.subr.bf16.mxu0 %v3238_v21  ;;  %1667 = vmatprep.mubr.bf16.mxu1 %v3257_v22  ;;  %v3349_v18 = vld [vmem:[%s3649_s21 + $0xc] ss:$40 sps:$4 sm:$0xff]   ;;  %v3326_v21 = vld [vmem:[%s4747_s1 + $0x3d0] ss:$8 sps:$4 sm:$0xff]  }
  0x5a   : > { %1873 = vmatprep.mubr.bf16.mxu0 %v3259_v23  ;;  %v3336_v22 = vld [vmem:[%s4747_s1 + $0x1e4] ss:$8 sps:$4 sm:$0xff]  }
  0x5b   : > { %1725 = vmatpush1.bf16.msra.mxu1 %v3233_v24  ;;  %v3340_v23 = vld [vmem:[%s4747_s1 + $0x3e4] ss:$8 sps:$4 sm:$0xff]   ;;  %v3334_v24 = vld [vmem:[%s4747_s1 + $0x1e0] ss:$8 sps:$4 sm:$0xff]  }
  0x5c   : > { %1931 = vmatpush1.bf16.msra.mxu0 %v3236_v25  ;;  %1726 = vmatprep.subr.bf16.mxu1 %v3246_v26  ;;  %v3338_v25 = vld [vmem:[%s4747_s1 + $0x3e0] ss:$8 sps:$4 sm:$0xff]   ;;  %v3343_v26 = vld [vmem:[%s4747_s1 + $0x1f4] ss:$8 sps:$4 sm:$0xff]  }
  0x5d   : > { %1932 = vmatprep.subr.bf16.mxu0 %v3250_v27  ;;  %v3346_v27 = vld [vmem:[%s4747_s1 + $0x3f4] ss:$8 sps:$4 sm:$0xff]  }
  0x5e   : > { %1668 = vmatmul.mubr.bf16.gmra.mrb[8].mxu1 %v3261_v31  ;;  %v3347_v31 = vld [vmem:[%s3649_s21 + $0x8] ss:$40 sps:$4 sm:$0xff]  }
  0x5f   : > { %1874 = vmatmul.mubr.bf16.gmra.mrb[8].mxu0 %v3265_v32  ;;  %1727 = vmatpush1.bf16.msra.mxu1 %v3244_v28  ;;  %v3341_v28 = vld [vmem:[%s4747_s1 + $0x1f0] ss:$8 sps:$4 sm:$0xff]  }
  0x60   : > { %1933 = vmatpush1.bf16.msra.mxu0 %v3248_v29  ;;  %1728 = vmatprep.subr.bf16.mxu1 %v3253_v30  ;;  %v3344_v29 = vld [vmem:[%s4747_s1 + $0x3f0] ss:$8 sps:$4 sm:$0xff]   ;;  %v3355_v30 = vld [vmem:[%s4747_s1 + $0x404] ss:$8 sps:$4 sm:$0xff]  }
  0x61   : > { %1934 = vmatprep.subr.bf16.mxu0 %v3256_v33  ;;  %1677 = vmatprep.mubr.bf16.mxu1 %v3275_v34  ;;  %v3350_v32 = vld [vmem:[%s3649_s21 + $0x18] ss:$40 sps:$4 sm:$0xff]   ;;  %v3358_v34 = vld [vmem:[%s4747_s1 + $0x414] ss:$8 sps:$4 sm:$0xff]  }
  0x62   : > { %1883 = vmatprep.mubr.bf16.mxu0 %v3277_v35  ;;  %v3353_v33 = vld [vmem:[%s4747_s1 + $0x400] ss:$8 sps:$4 sm:$0xff]   ;;  %v3359_v35 = vld [vmem:[%s3649_s21 + $0x5c] ss:$40 sps:$4 sm:$0xff]  }
  0x63   : > { %1729 = vmatpush1.bf16.msra.mxu1 %v3251_v36  ;;  %v3361_v36 = vld [vmem:[%s3649_s21 + $0x6c] ss:$40 sps:$4 sm:$0xff]  }
  0x64   : > { %1935 = vmatpush1.bf16.msra.mxu0 %v3254_v37  ;;  %1730 = vmatprep.subr.bf16.mxu1 %v3264_v38  ;;  %v3356_v37 = vld [vmem:[%s4747_s1 + $0x410] ss:$8 sps:$4 sm:$0xff]   ;;  %v3367_v38 = vld [vmem:[%s4747_s1 + $0x424] ss:$8 sps:$4 sm:$0xff]  }
  0x65   : > { %1936 = vmatprep.subr.bf16.mxu0 %v3268_v39  ;;  %v3363_v39 = vld [vmem:[%s3649_s21 + $0x58] ss:$40 sps:$4 sm:$0xff]  }
  0x66   : > { %1678 = vmatmul.mubr.bf16.gmra.mrb[12].mxu1 %v3279_v43  ;;  %v3371_v43 = vld [vmem:[%s3649_s21 + $0xac] ss:$40 sps:$4 sm:$0xff]  }
  0x67   : > { %1884 = vmatmul.mubr.bf16.gmra.mrb[12].mxu0 %v3283_v44  ;;  %1731 = vmatpush1.bf16.msra.mxu1 %v3262_v40  ;;  %v3364_v40 = vld [vmem:[%s3649_s21 + $0x68] ss:$40 sps:$4 sm:$0xff]   ;;  %v3373_v44 = vld [vmem:[%s3649_s21 + $0xbc] ss:$40 sps:$4 sm:$0xff]  }
  0x68   : > { %1937 = vmatpush1.bf16.msra.mxu0 %v3266_v41  ;;  %1732 = vmatprep.subr.bf16.mxu1 %v3271_v42  ;;  %v3365_v41 = vld [vmem:[%s4747_s1 + $0x420] ss:$8 sps:$4 sm:$0xff]   ;;  %v3370_v42 = vld [vmem:[%s4747_s1 + $0x434] ss:$8 sps:$4 sm:$0xff]  }
  0x69   : > { %1938 = vmatprep.subr.bf16.mxu0 %v3274_v45  ;;  %1687 = vmatprep.mubr.bf16.mxu1 %v3293_v46  ;;  %v3368_v45 = vld [vmem:[%s4747_s1 + $0x430] ss:$8 sps:$4 sm:$0xff]   ;;  %v3379_v46 = vld [vmem:[%s4747_s1 + $0x444] ss:$8 sps:$4 sm:$0xff]  }
  0x6a   : > { %1893 = vmatprep.mubr.bf16.mxu0 %v3295_v47  ;;  %v3375_v47 = vld [vmem:[%s3649_s21 + $0xa8] ss:$40 sps:$4 sm:$0xff]  }
  0x6b   : > { %1733 = vmatpush1.bf16.msra.mxu1 %v3269_v48  ;;  %v3376_v48 = vld [vmem:[%s3649_s21 + $0xb8] ss:$40 sps:$4 sm:$0xff]  }
  0x6c   : > { %1939 = vmatpush1.bf16.msra.mxu0 %v3272_v49  ;;  %1734 = vmatprep.subr.bf16.mxu1 %v3282_v50  ;;  %v3377_v49 = vld [vmem:[%s4747_s1 + $0x440] ss:$8 sps:$4 sm:$0xff]   ;;  %v3382_v50 = vld [vmem:[%s4747_s1 + $0x454] ss:$8 sps:$4 sm:$0xff]  }
  0x6d   : > { %1940 = vmatprep.subr.bf16.mxu0 %v3286_v51  ;;  %v3383_v51 = vld [vmem:[%s3649_s21 + $0xfc] ss:$40 sps:$4 sm:$0xff]  }
  0x6e   : > { %1688 = vmatmul.mubr.bf16.gmra.mrb[16].mxu1 %v3297_v55  ;;  %v3387_v55 = vld [vmem:[%s3649_s21 + $0xf8] ss:$40 sps:$4 sm:$0xff]  }
  0x6f   : > { %1894 = vmatmul.mubr.bf16.gmra.mrb[16].mxu0 %v3301_v56  ;;  %1735 = vmatpush1.bf16.msra.mxu1 %v3280_v52  ;;  %v3385_v52 = vld [vmem:[%s3649_s21 + $0x10c] ss:$40 sps:$4 sm:$0xff]   ;;  %v3388_v56 = vld [vmem:[%s3649_s21 + $0x108] ss:$40 sps:$4 sm:$0xff]  }
  0x70   : > { %1941 = vmatpush1.bf16.msra.mxu0 %v3284_v53  ;;  %1736 = vmatprep.subr.bf16.mxu1 %v3289_v54  ;;  %v3380_v53 = vld [vmem:[%s4747_s1 + $0x450] ss:$8 sps:$4 sm:$0xff]   ;;  %v3391_v54 = vld [vmem:[%s4747_s1 + $0x464] ss:$8 sps:$4 sm:$0xff]  }
  0x71   : > { %1942 = vmatprep.subr.bf16.mxu0 %v3292_v57  ;;  %1697 = vmatprep.mubr.bf16.mxu1 %v3311_v58  ;;  %v3389_v57 = vld [vmem:[%s4747_s1 + $0x460] ss:$8 sps:$4 sm:$0xff]   ;;  %v3394_v58 = vld [vmem:[%s4747_s1 + $0x474] ss:$8 sps:$4 sm:$0xff]  }
  0x72   : > { %1903 = vmatprep.mubr.bf16.mxu0 %v3313_v59  ;;  %v3395_v59 = vld [vmem:[%s3649_s21 + $0x14c] ss:$40 sps:$4 sm:$0xff]  }
  0x73   : > { %1737 = vmatpush1.bf16.msra.mxu1 %v3287_v60  ;;  %v3397_v60 = vld [vmem:[%s3649_s21 + $0x15c] ss:$40 sps:$4 sm:$0xff]  }
  0x74   : > { %1943 = vmatpush1.bf16.msra.mxu0 %v3290_v61  ;;  %1738 = vmatprep.subr.bf16.mxu1 %v3300_v62  ;;  %v3392_v61 = vld [vmem:[%s4747_s1 + $0x470] ss:$8 sps:$4 sm:$0xff]   ;;  %v3403_v62 = vld [vmem:[%s4747_s1 + $0x484] ss:$8 sps:$4 sm:$0xff]  }
  0x75   : > { %1944 = vmatprep.subr.bf16.mxu0 %v3304_v63  ;;  %v3399_v63 = vld [vmem:[%s3649_s21 + $0x148] ss:$40 sps:$4 sm:$0xff]  }
  0x76   : > { %1698 = vmatmul.mubr.bf16.gmra.mrb[20].mxu1 %v3315_v2  ;;  %v3406_v2 = vld [vmem:[%s4747_s1 + $0x494] ss:$8 sps:$4 sm:$0xff]  }
  0x77   : > { %1904 = vmatmul.mubr.bf16.gmra.mrb[20].mxu0 %v3319_v3  ;;  %1739 = vmatpush1.bf16.msra.mxu1 %v3298_v0  ;;  %v3400_v0 = vld [vmem:[%s3649_s21 + $0x158] ss:$40 sps:$4 sm:$0xff]   ;;  %v3407_v3 = vld [vmem:[%s3649_s21 + $0x19c] ss:$40 sps:$4 sm:$0xff]  }
  0x78   : > { %1945 = vmatpush1.bf16.msra.mxu0 %v3302_v1  ;;  %1740 = vmatprep.subr.bf16.mxu1 %v3307_v4  ;;  %v3401_v1 = vld [vmem:[%s4747_s1 + $0x480] ss:$8 sps:$4 sm:$0xff]   ;;  %v3409_v4 = vld [vmem:[%s3649_s21 + $0x1ac] ss:$40 sps:$4 sm:$0xff]  }
  0x79   : > { %1946 = vmatprep.subr.bf16.mxu0 %v3310_v5  ;;  %1707 = vmatprep.mubr.bf16.mxu1 %v3329_v6  ;;  %v3404_v5 = vld [vmem:[%s4747_s1 + $0x490] ss:$8 sps:$4 sm:$0xff]   ;;  %v3415_v6 = vld [vmem:[%s4747_s1 + $0x4a4] ss:$8 sps:$4 sm:$0xff]  }
  0x7a   : > { %1913 = vmatprep.mubr.bf16.mxu0 %v3331_v7  ;;  %v3411_v7 = vld [vmem:[%s3649_s21 + $0x198] ss:$40 sps:$4 sm:$0xff]  }
  0x7b   : > { %1741 = vmatpush1.bf16.msra.mxu1 %v3305_v8  ;;  %v3412_v8 = vld [vmem:[%s3649_s21 + $0x1a8] ss:$40 sps:$4 sm:$0xff]  }
  0x7c   : > { %1947 = vmatpush1.bf16.msra.mxu0 %v3308_v9  ;;  %1742 = vmatprep.subr.bf16.mxu1 %v3318_v10  ;;  %v3413_v9 = vld [vmem:[%s4747_s1 + $0x4a0] ss:$8 sps:$4 sm:$0xff]   ;;  %v3418_v10 = vld [vmem:[%s4747_s1 + $0x4b4] ss:$8 sps:$4 sm:$0xff]  }
  0x7d   : > { %1948 = vmatprep.subr.bf16.mxu0 %v3322_v11  ;;  %v3419_v11 = vld [vmem:[%s3649_s21 + $0x1ec] ss:$40 sps:$4 sm:$0xff]  }
  0x7e   : > { %1708 = vmatmul.mubr.bf16.gmra.mrb[24].mxu1 %v3333_v14  ;;  %v3427_v14 = vld [vmem:[%s4747_s1 + $0x4c4] ss:$8 sps:$4 sm:$0xff]  }
  0x7f   : > { %1914 = vmatmul.mubr.bf16.gmra.mrb[24].mxu0 %v3337_v15  ;;  %1743 = vmatpush1.bf16.msra.mxu1 %v3316_v12  ;;  %v3421_v12 = vld [vmem:[%s3649_s21 + $0x1fc] ss:$40 sps:$4 sm:$0xff]   ;;  %v3423_v15 = vld [vmem:[%s3649_s21 + $0x1e8] ss:$40 sps:$4 sm:$0xff]  }
  0x80   : > { %1949 = vmatpush1.bf16.msra.mxu0 %v3320_v13  ;;  %1744 = vmatprep.subr.bf16.mxu1 %v3325_v16  ;;  %v3416_v13 = vld [vmem:[%s4747_s1 + $0x4b0] ss:$8 sps:$4 sm:$0xff]  }
  0x81   : > { %1950 = vmatprep.subr.bf16.mxu0 %v3328_v17  ;;  %1750 = vmatprep.mubr.bf16.mxu1 %v3349_v18  ;;  %v3424_v16 = vld [vmem:[%s3649_s21 + $0x1f8] ss:$40 sps:$4 sm:$0xff]   ;;  %v3430_v18 = vld [vmem:[%s4747_s1 + $0x4d4] ss:$8 sps:$4 sm:$0xff]  }
  0x82   : > { %1956 = vmatprep.mubr.bf16.mxu0 %v3352_v19  ;;  %v3425_v17 = vld [vmem:[%s4747_s1 + $0x4c0] ss:$8 sps:$4 sm:$0xff]   ;;  %v3439_v19 = vld [vmem:[%s3649_s21 + $0x24] ss:$40 sps:$4 sm:$0xff]  }
  0x83   : > { %1745 = vmatpush1.bf16.msra.mxu1 %v3323_v20  ;;  %v3442_v20 = vld [vmem:[%s3649_s21 + $0x164] ss:$40 sps:$4 sm:$0xff]  }
  0x84   : > { %1951 = vmatpush1.bf16.msra.mxu0 %v3326_v21  ;;  %1746 = vmatprep.subr.bf16.mxu1 %v3336_v22  ;;  %v3428_v21 = vld [vmem:[%s4747_s1 + $0x4d0] ss:$8 sps:$4 sm:$0xff]   ;;  %v3433_v22 = vld [vmem:[%s4747_s1 + $0x4e4] ss:$8 sps:$4 sm:$0xff]  }
  0x85   : > { %1952 = vmatprep.subr.bf16.mxu0 %v3340_v23  ;;  %v3431_v23 = vld [vmem:[%s4747_s1 + $0x4e0] ss:$8 sps:$4 sm:$0xff]  }
  0x87   : > { %1747 = vmatpush1.bf16.msra.mxu1 %v3334_v24  ;;  %v3436_v24 = vld [vmem:[%s4747_s1 + $0x4f4] ss:$8 sps:$4 sm:$0xff]  }
  0x88   : > { %1953 = vmatpush1.bf16.msra.mxu0 %v3338_v25  ;;  %1748 = vmatprep.subr.bf16.mxu1 %v3343_v26  ;;  %v3434_v25 = vld [vmem:[%s4747_s1 + $0x4f0] ss:$8 sps:$4 sm:$0xff]   ;;  %v3437_v26 = vld [vmem:[%s3649_s21 + $0x20] ss:$40 sps:$4 sm:$0xff]  }
  0x89   : > { %1954 = vmatprep.subr.bf16.mxu0 %v3346_v27  ;;  %v3440_v27 = vld [vmem:[%s3649_s21 + $0x160] ss:$40 sps:$4 sm:$0xff]  }
  0x8b   : > { %1749 = vmatpush1.bf16.msra.mxu1 %v3341_v28  ;;  %v3443_v28 = vld [vmem:[%s3649_s21 + $0x74] ss:$40 sps:$4 sm:$0xff]  }
  0x8c   : > { %1955 = vmatpush1.bf16.msra.mxu0 %v3344_v29  ;;  %2932 = vmatprep.subr.bf16.mxu1 %v3355_v30  ;;  %v3445_v29 = vld [vmem:[%s3649_s21 + $0x1b4] ss:$40 sps:$4 sm:$0xff]  }
  0x8d   : > { %2027 = vmatprep.subr.bf16.mxu0 %v3355_v30  ;;  %v3447_v30 = vld [vmem:[%s3649_s21 + $0x70] ss:$40 sps:$4 sm:$0xff]  }
  0x8e   : > { %1751 = vmatmul.mubr.bf16.vlgmr.msra.gmra.mrb[0].mxu1 %v3347_v31  ;;  %v3448_v31 = vld [vmem:[%s3649_s21 + $0x1b0] ss:$40 sps:$4 sm:$0xff]  }
  0x8f   : > { %1957 = vmatmul.mubr.bf16.vlgmr.msra.gmra.mrb[0].mxu0 %v3350_v32  ;;  %2948 = vmatpush1.bf16.msra.mxu1 %v3353_v33  ;;  %v3449_v32 = vld [vmem:[%s3649_s21 + $0xc4] ss:$40 sps:$4 sm:$0xff]  }
  0x90   : > { %2028 = vmatpush1.bf16.msra.mxu0 %v3353_v33  ;;  %2933 = vmatprep.subr.bf16.mxu1 %v3358_v34  ;;  %v3451_v33 = vld [vmem:[%s3649_s21 + $0x204] ss:$40 sps:$4 sm:$0xff]  }
  0x91   : > { %2029 = vmatprep.subr.bf16.mxu0 %v3358_v34  ;;  %1760 = vmatprep.mubr.bf16.mxu1 %v3359_v35  ;;  %v3453_v34 = vld [vmem:[%s3649_s21 + $0xc0] ss:$40 sps:$4 sm:$0xff]  }
  0x92   : > { %1966 = vmatprep.mubr.bf16.mxu0 %v3361_v36  ;;  %v3454_v35 = vld [vmem:[%s3649_s21 + $0x200] ss:$40 sps:$4 sm:$0xff]   ;;  %v3455_v36 = vld [vmem:[%s3649_s21 + $0x114] ss:$40 sps:$4 sm:$0xff]  }
  0x93   : > { %2949 = vmatpush1.bf16.msra.mxu1 %v3356_v37 }
  0x94   : > { %2030 = vmatpush1.bf16.msra.mxu0 %v3356_v37  ;;  %2934 = vmatprep.subr.bf16.mxu1 %v3367_v38  ;;  %v3457_v37 = vld [vmem:[%s3649_s21 + $0x110] ss:$40 sps:$4 sm:$0xff]  }
  0x95   : > { %2031 = vmatprep.subr.bf16.mxu0 %v3367_v38 }
  0x96   : > { %1761 = vmatmul.mubr.bf16.gmra.mrb[4].mxu1 %v3363_v39 }
  0x97   : > { %1967 = vmatmul.mubr.bf16.gmra.mrb[4].mxu0 %v3364_v40  ;;  %2950 = vmatpush1.bf16.msra.mxu1 %v3365_v41 }
  0x98   : > { %2032 = vmatpush1.bf16.msra.mxu0 %v3365_v41  ;;  %2935 = vmatprep.subr.bf16.mxu1 %v3370_v42 }
  0x99   : > { %2033 = vmatprep.subr.bf16.mxu0 %v3370_v42  ;;  %1770 = vmatprep.mubr.bf16.mxu1 %v3371_v43 }
  0x9a   : > { %1976 = vmatprep.mubr.bf16.mxu0 %v3373_v44 }
  0x9b   : > { %2951 = vmatpush1.bf16.msra.mxu1 %v3368_v45 }
  0x9c   : > { %2034 = vmatpush1.bf16.msra.mxu0 %v3368_v45  ;;  %2936 = vmatprep.subr.bf16.mxu1 %v3379_v46 }
  0x9d   : > { %2035 = vmatprep.subr.bf16.mxu0 %v3379_v46 }
  0x9e   : > { %1771 = vmatmul.mubr.bf16.gmra.mrb[8].mxu1 %v3375_v47 }
  0x9f   : > { %1977 = vmatmul.mubr.bf16.gmra.mrb[8].mxu0 %v3376_v48  ;;  %2952 = vmatpush1.bf16.msra.mxu1 %v3377_v49 }
  0xa0   : > { %2036 = vmatpush1.bf16.msra.mxu0 %v3377_v49  ;;  %2937 = vmatprep.subr.bf16.mxu1 %v3382_v50  ;;  %v455_v49 = vlaneseq }
  0xa1   : > { %2037 = vmatprep.subr.bf16.mxu0 %v3382_v50  ;;  %1780 = vmatprep.mubr.bf16.mxu1 %v3383_v51 }
  0xa2   : > { %1986 = vmatprep.mubr.bf16.mxu0 %v3385_v52  ;;  %v456_v51 = vshrl.u32 %v455_v49, 7 }
  0xa3   : > { %2953 = vmatpush1.bf16.msra.mxu1 %v3380_v53 }
  0xa4   : > { %2038 = vmatpush1.bf16.msra.mxu0 %v3380_v53  ;;  %2938 = vmatprep.subr.bf16.mxu1 %v3391_v54 }
  0xa5   : > { %2039 = vmatprep.subr.bf16.mxu0 %v3391_v54 }
  0xa6   : > { %1781 = vmatmul.mubr.bf16.gmra.mrb[12].mxu1 %v3387_v55  ;;  %v457_v55 = vsub.s32 0, %v456_v51 }
  0xa7   : > { %1987 = vmatmul.mubr.bf16.gmra.mrb[12].mxu0 %v3388_v56  ;;  %2954 = vmatpush1.bf16.msra.mxu1 %v3389_v57 }
  0xa8   : > { %2040 = vmatpush1.bf16.msra.mxu0 %v3389_v57  ;;  %2939 = vmatprep.subr.bf16.mxu1 %v3394_v58  ;;  %v453_v57 = vld [vmem:[%s4748_s2] sm:$0x3] }
  0xa9   : > { %2041 = vmatprep.subr.bf16.mxu0 %v3394_v58  ;;  %1790 = vmatprep.mubr.bf16.mxu1 %v3395_v59  ;;  %v461_v58 = vsub.s32 1, %v456_v51  ;;  %v4101_v59 = vrot.slane %v453_v57, %v457_v55 }
  0xaa   : > { %1996 = vmatprep.mubr.bf16.mxu0 %v3397_v60 }
  0xab   : > { %2955 = vmatpush1.bf16.msra.mxu1 %v3392_v61  ;;  %v4103_v60 = vrot.slane %v453_v57, %v461_v58 }
  0xac   : > { %2042 = vmatpush1.bf16.msra.mxu0 %v3392_v61  ;;  %2940 = vmatprep.subr.bf16.mxu1 %v3403_v62 }
  0xad   : > { %2043 = vmatprep.subr.bf16.mxu0 %v3403_v62 }
  0xae   : > { %1791 = vmatmul.mubr.bf16.gmra.mrb[16].mxu1 %v3399_v63 }
  0xaf   : > { %1997 = vmatmul.mubr.bf16.gmra.mrb[16].mxu0 %v3400_v0  ;;  %2956 = vmatpush1.bf16.msra.mxu1 %v3401_v1 }
  0xb0   : > { %2044 = vmatpush1.bf16.msra.mxu0 %v3401_v1  ;;  %2941 = vmatprep.subr.bf16.mxu1 %v3406_v2 }
  0xb1   : > { %2045 = vmatprep.subr.bf16.mxu0 %v3406_v2  ;;  %1800 = vmatprep.mubr.bf16.mxu1 %v3407_v3 }
  0xb2   : > { %2006 = vmatprep.mubr.bf16.mxu0 %v3409_v4 }
  0xb3   : > { %2957 = vmatpush1.bf16.msra.mxu1 %v3404_v5 }
  0xb4   : > { %2046 = vmatpush1.bf16.msra.mxu0 %v3404_v5  ;;  %2942 = vmatprep.subr.bf16.mxu1 %v3415_v6 }
  0xb5   : > { %2047 = vmatprep.subr.bf16.mxu0 %v3415_v6 }
  0xb6   : > { %1801 = vmatmul.mubr.bf16.gmra.mrb[20].mxu1 %v3411_v7 }
  0xb7   : > { %2007 = vmatmul.mubr.bf16.gmra.mrb[20].mxu0 %v3412_v8  ;;  %2958 = vmatpush1.bf16.msra.mxu1 %v3413_v9 }
  0xb8   : > { %2048 = vmatpush1.bf16.msra.mxu0 %v3413_v9  ;;  %2943 = vmatprep.subr.bf16.mxu1 %v3418_v10 }
  0xb9   : > { %2049 = vmatprep.subr.bf16.mxu0 %v3418_v10  ;;  %1810 = vmatprep.mubr.bf16.mxu1 %v3419_v11 }
  0xba   : > { %2016 = vmatprep.mubr.bf16.mxu0 %v3421_v12 }
  0xbb   : > { %2959 = vmatpush1.bf16.msra.mxu1 %v3416_v13 }
  0xbc   : > { %2050 = vmatpush1.bf16.msra.mxu0 %v3416_v13  ;;  %2944 = vmatprep.subr.bf16.mxu1 %v3427_v14 }
  0xbd   : > { %2051 = vmatprep.subr.bf16.mxu0 %v3427_v14 }
  0xbe   : > { %1811 = vmatmul.mubr.bf16.gmra.mrb[24].mxu1 %v3423_v15 }
  0xbf   : > { %2017 = vmatmul.mubr.bf16.gmra.mrb[24].mxu0 %v3424_v16  ;;  %2960 = vmatpush1.bf16.msra.mxu1 %v3425_v17 }
  0xc0   : > { %2052 = vmatpush1.bf16.msra.mxu0 %v3425_v17  ;;  %2945 = vmatprep.subr.bf16.mxu1 %v3430_v18 }
  0xc1   : > { %2053 = vmatprep.subr.bf16.mxu0 %v3430_v18  ;;  %2059 = vmatprep.mubr.bf16.mxu0 %v3439_v19 }
  0xc2   : > { %2099 = vmatprep.mubr.bf16.mxu1 %v3442_v20 }
  0xc3   : > { %2961 = vmatpush1.bf16.msra.mxu1 %v3428_v21 }
  0xc4   : > { %2054 = vmatpush1.bf16.msra.mxu0 %v3428_v21  ;;  %2946 = vmatprep.subr.bf16.mxu1 %v3433_v22 }
  0xc5   : > { %2055 = vmatprep.subr.bf16.mxu0 %v3433_v22 }
  0xc7   : > { %2962 = vmatpush1.bf16.msra.mxu1 %v3431_v23 }
  0xc8   : > { %2056 = vmatpush1.bf16.msra.mxu0 %v3431_v23  ;;  %2947 = vmatprep.subr.bf16.mxu1 %v3436_v24 }
  0xc9   : > { %2057 = vmatprep.subr.bf16.mxu0 %v3436_v24 }
  0xcb   : > { %2963 = vmatpush1.bf16.msra.mxu1 %v3434_v25 }
  0xcc   : > { %2058 = vmatpush1.bf16.msra.mxu0 %v3434_v25 }
  0xce   : > { %2100 = vmatmul.mubr.bf16.vlgmr.msra.gmra.mrb[28].mxu1 %v3440_v27 }
  0xcf   : > { %2060 = vmatmul.mubr.bf16.vlgmr.msra.gmra.mrb[0].mxu0 %v3437_v26  ;;  %2109 = vmatprep.mubr.bf16.mxu1 %v3445_v29 }
  0xd0   : > { %2069 = vmatprep.mubr.bf16.mxu0 %v3443_v28 }
  0xd6   : > { %2110 = vmatmul.mubr.bf16.gmra.mrb[32].mxu1 %v3448_v31 }
  0xd7   : > { %2070 = vmatmul.mubr.bf16.gmra.mrb[4].mxu0 %v3447_v30  ;;  %2119 = vmatprep.mubr.bf16.mxu1 %v3451_v33 }
  0xd8   : > { %2079 = vmatprep.mubr.bf16.mxu0 %v3449_v32 }
  0xde   : > { %2120 = vmatmul.mubr.bf16.gmra.mrb[36].mxu1 %v3454_v35 }
  0xdf   : > { %2080 = vmatmul.mubr.bf16.gmra.mrb[8].mxu0 %v3453_v34 }
  0xe0   : > { %2089 = vmatprep.mubr.bf16.mxu0 %v3455_v36 }
  0xe7   : > { %2090 = vmatmul.mubr.bf16.gmra.mrb[12].mxu0 %v3457_v37 }
 0x161   : > { %v4066_v38 = vpop.f32.mrb[0].mxu1 }
 0x162   : > { %v4068_v39 = vpop.f32.mrb[1].mxu1 }
 0x163   : > { %v4070_v40 = vpop.f32.mrb[2].mxu1 }
 0x164   : > { %v4072_v41 = vpop.f32.mrb[3].mxu1 }
 0x169   : > { %v4074_v42 = vpop.f32.mrb[4].mxu1 }
 0x16a   : > { %v4076_v43 = vpop.f32.mrb[5].mxu1 }
 0x16b   : > { %v4078_v44 = vpop.f32.mrb[6].mxu1 }
 0x16c   : > { %v4080_v45 = vpop.f32.mrb[7].mxu1 }
 0x171   : > { %v4082_v46 = vpop.f32.mrb[8].mxu1 }
 0x172   : > { %v4084_v47 = vpop.f32.mrb[9].mxu1 }
 0x173   : > { %v4086_v48 = vpop.f32.mrb[10].mxu1 }
 0x174   : > { %v4088_v50 = vpop.f32.mrb[11].mxu1 }
 0x179   : > { %v4090_v52 = vpop.f32.mrb[12].mxu1 }
 0x17a   : > { %v4092_v53 = vpop.f32.mrb[13].mxu1 }
 0x17b   : > { %v4094_v54 = vpop.f32.mrb[14].mxu1 }
 0x17c   : > { %v4096_v56 = vpop.f32.mrb[15].mxu1 }
 0x181   : > { %v1792_v61 = vpop.f32.mrb[16].mxu1 }
 0x182   : > { %v1998_v62 = vpop.f32.mrb[16].mxu0  ;;  %v2996_v63 = vadd.f32 %v1792_v61, %v4101_v59  ;;  %v1794_v0 = vpop.f32.mrb[17].mxu1 }
 0x183   : > { %v2000_v1 = vpop.f32.mrb[17].mxu0  ;;  %v2999_v2 = vadd.f32 %v1794_v0, %v4103_v60  ;;  %v1796_v3 = vpop.f32.mrb[18].mxu1  ;;  %v2966_v0 = vadd.f32 %v4068_v39, %v4103_v60  ;;  %v4159_v39 = vadd.f32 %v4080_v45, %v4103_v60  ;;  %v4174_v45 = vadd.f32 %v4086_v48, %v4101_v59 }
 0x184   : > { %v2002_v4 = vpop.f32.mrb[18].mxu0  ;;  %v2997_v5 = vadd.f32 %v2996_v63, %v1998_v62  ;;  %v3002_v6 = vadd.f32 %v1796_v3, %v4101_v59  ;;  %v1798_v7 = vpop.f32.mrb[19].mxu1  ;;  %v2964_v63 = vadd.f32 %v4066_v38, %v4101_v59  ;;  %v4147_v3 = vadd.f32 %v4074_v42, %v4101_v59 }
 0x185   : > { %v2004_v8 = vpop.f32.mrb[19].mxu0  ;;  %v3000_v9 = vadd.f32 %v2999_v2, %v2000_v1  ;;  %v3005_v10 = vadd.f32 %v1798_v7, %v4103_v60  ;;  %v2968_v1 = vadd.f32 %v4070_v40, %v4101_v59  ;;  %v2970_v2 = vadd.f32 %v4072_v41, %v4103_v60 }
 0x186   : > { %v4109_v11 = vadd.f32 %v3002_v6, %v2002_v4  ;;  %v4151_v4 = vadd.f32 %v4076_v43, %v4103_v60  ;;  %v4155_v38 = vadd.f32 %v4078_v44, %v4101_v59  ;;  %v4163_v41 = vadd.f32 %v4082_v46, %v4101_v59  ;;  %v2158_v44 = vld [vmem:[%s4749_s3] sm:$0xff] }
 0x187   : > { %v4111_v12 = vadd.f32 %v3005_v10, %v2004_v8  ;;  %v4167_v42 = vadd.f32 %v4084_v47, %v4103_v60  ;;  %v4178_v46 = vadd.f32 %v4088_v50, %v4103_v60  ;;  %v2846_v47 = vld [vmem:[%s4749_s3 + $0xe0] sm:$0xff] }
 0x188   : > { %v2174_v50 = vld [vmem:[%s4749_s3 + $0x80] sm:$0xff] }
 0x189   : > { %v1802_v13 = vpop.f32.mrb[20].mxu1 }
 0x18a   : > { %v2008_v14 = vpop.f32.mrb[20].mxu0  ;;  %v3008_v15 = vadd.f32 %v1802_v13, %v4101_v59  ;;  %v1804_v16 = vpop.f32.mrb[21].mxu1  ;;  %v2874_v13 = vld [vmem:[%s4749_s3 + $0x1c0] sm:$0xff] }
 0x18b   : > { %v2010_v17 = vpop.f32.mrb[21].mxu0  ;;  %v3011_v18 = vadd.f32 %v1804_v16, %v4103_v60  ;;  %v1806_v19 = vpop.f32.mrb[22].mxu1 }
 0x18c   : > { %v2012_v20 = vpop.f32.mrb[22].mxu0  ;;  %v4115_v21 = vadd.f32 %v3008_v15, %v2008_v14  ;;  %v3014_v22 = vadd.f32 %v1806_v19, %v4101_v59  ;;  %v1808_v23 = vpop.f32.mrb[23].mxu1  ;;  %v2862_v19 = vld [vmem:[%s4749_s3 + $0x160] sm:$0xff] }
 0x18d   : > { %v2014_v24 = vpop.f32.mrb[23].mxu0  ;;  %v4118_v25 = vadd.f32 %v3011_v18, %v2010_v17  ;;  %v3017_v26 = vadd.f32 %v1808_v23, %v4103_v60 }
 0x18e   : > { %v4121_v27 = vadd.f32 %v3014_v22, %v2012_v20 }
 0x18f   : > { %v4123_v28 = vadd.f32 %v3017_v26, %v2014_v24  ;;  %v2890_v26 = vld [vmem:[%s4749_s3 + $0x240] sm:$0xff] }
 0x191   : > { %v1812_v29 = vpop.f32.mrb[24].mxu1 }
 0x192   : > { %v2018_v30 = vpop.f32.mrb[24].mxu0  ;;  %v3020_v31 = vadd.f32 %v1812_v29, %v4101_v59  ;;  %v1814_v32 = vpop.f32.mrb[25].mxu1  ;;  %v2918_v29 = vld [vmem:[%s4749_s3 + $0x320] sm:$0xff] }
 0x193   : > { %v2020_v33 = vpop.f32.mrb[25].mxu0  ;;  %v3023_v34 = vadd.f32 %v1814_v32, %v4103_v60  ;;  %v1816_v35 = vpop.f32.mrb[26].mxu1 }
 0x194   : > { %v2022_v36 = vpop.f32.mrb[26].mxu0  ;;  %v4127_v37 = vadd.f32 %v3020_v31, %v2018_v30  ;;  %v3026_v49 = vadd.f32 %v1816_v35, %v4101_v59  ;;  %v1818_v51 = vpop.f32.mrb[27].mxu1  ;;  %v2159_v31 = vld [vmem:[%s4749_s3 + $0x8] sm:$0xff] }
 0x195   : > { %v2024_v55 = vpop.f32.mrb[27].mxu0  ;;  %v4130_v57 = vadd.f32 %v3023_v34, %v2020_v33  ;;  %v3029_v58 = vadd.f32 %v1818_v51, %v4103_v60  ;;  %v4216_v33 = vadd.f32 %v4094_v54, %v4101_v59  ;;  %v4220_v34 = vadd.f32 %v4096_v56, %v4103_v60  ;;  %v2847_v35 = vld [vmem:[%s4749_s3 + $0xe8] sm:$0xff] }
 0x196   : > { %v4133_v61 = vadd.f32 %v3026_v49, %v2022_v36  ;;  %v2175_v56 = vld [vmem:[%s4749_s3 + $0x88] sm:$0xff] }
 0x197   : > { %v4135_v62 = vadd.f32 %v3029_v58, %v2024_v55 }
 0x1a1   : > { %v2101_v6 = vpop.f32.mrb[28].mxu1 }
 0x1a2   : > { %v2061_v40 = vpop.f32.mrb[0].mxu0  ;;  %v2998_v7 = vadd.f32 %v2997_v5, %v2101_v6  ;;  %v2103_v10 = vpop.f32.mrb[29].mxu1  ;;  %v2902_v5 = vld [vmem:[%s4749_s3 + $0x2a0] sm:$0xff] }
 0x1a3   : > { %v2965_v43 = vadd.f32 %v2964_v63, %v2061_v40  ;;  %v2063_v8 = vpop.f32.mrb[1].mxu0  ;;  %v3001_v15 = vadd.f32 %v3000_v9, %v2103_v10  ;;  %v2105_v16 = vpop.f32.mrb[30].mxu1  ;;  %v4198_v9 = vadd.f32 %v4090_v52, %v4101_v59  ;;  %v4212_v52 = vadd.f32 %v4092_v53, %v4103_v60  ;;  %v2903_v53 = vld [vmem:[%s4749_s3 + $0x2a8] sm:$0xff]  ;;  %v2904_v10 = vld [vmem:[%s4749_s3 + $0x2b0] sm:$0xff] }
 0x1a4   : > { %v2967_v14 = vadd.f32 %v2966_v0, %v2063_v8  ;;  %v2065_v48 = vpop.f32.mrb[2].mxu0  ;;  %v2146_v18 = vmax.f32 %v2998_v7, 0.0  ;;  %v3004_v22 = vadd.f32 %v4109_v11, %v2105_v16  ;;  %v2107_v24 = vpop.f32.mrb[31].mxu1  ;;  %v2863_v0 = vld [vmem:[%s4749_s3 + $0x168] sm:$0xff]  ;;  %v2848_v7 = vld [vmem:[%s4749_s3 + $0xf0] sm:$0xff] }
 0x1a5   : > { %v2130_v17 = vmax.f32 %v2965_v43, 0.0  ;;  %v2969_v20 = vadd.f32 %v2968_v1, %v2065_v48  ;;  %v2067_v23 = vpop.f32.mrb[3].mxu0  ;;  %v3007_v32 = vadd.f32 %v4111_v12, %v2107_v24  ;;  %v2875_v12 = vld [vmem:[%s4749_s3 + $0x1c8] sm:$0xff]  ;;  %v2147_v36 = vmax.f32 %v3001_v15, 0.0  ;;  %v2876_v8 = vld [vmem:[%s4749_s3 + $0x1d0] sm:$0xff] }
 0x1a6   : > { %v2131_v30 = vmax.f32 %v2967_v14, 0.0  ;;  %v2971_v11 = vadd.f32 %v2970_v2, %v2067_v23  ;;  %v4234_v60 = vmul.f32 %v2174_v50, %v2146_v18  ;;  %v4236_v55 = vmul.f32 %v2862_v19, %v2146_v18  ;;  %v2891_v1 = vld [vmem:[%s4749_s3 + $0x248] sm:$0xff]  ;;  %v2160_v2 = vld [vmem:[%s4749_s3 + $0x10] sm:$0xff]  ;;  %v2161_v19 = vld [vmem:[%s4749_s3 + $0x18] sm:$0xff] }
 0x1a7   : > { %v2186_v49 = vmul.f32 %v2158_v44, %v2130_v17  ;;  %v2281_v54 = vmul.f32 %v2846_v47, %v2130_v17  ;;  %v2376_v59 = vmul.f32 %v2874_v13, %v2130_v17  ;;  %v2471_v51 = vmul.f32 %v2902_v5, %v2130_v17  ;;  %v2919_v14 = vld [vmem:[%s4749_s3 + $0x328] sm:$0xff]  ;;  %v2176_v50 = vld [vmem:[%s4749_s3 + $0x90] sm:$0xff] }
 0x1a8   : > { %v4238_v58 = vmul.f32 %v2890_v26, %v2146_v18  ;;  %v4240_v63 = vmul.f32 %v2918_v29, %v2146_v18  ;;  %v2187_v40 = vmul.f32 %v2159_v31, %v2131_v30  ;;  %v2282_v6 = vmul.f32 %v2847_v35, %v2131_v30 }
 0x1a9   : > { %v2377_v43 = vmul.f32 %v2875_v12, %v2131_v30  ;;  %v2472_v44 = vmul.f32 %v2903_v53, %v2131_v30  ;;  %v2111_v13 = vpop.f32.mrb[32].mxu1  ;;  %v4260_v5 = vmul.f32 %v2175_v56, %v2147_v36  ;;  %v2132_v15 = vmax.f32 %v2969_v20, 0.0  ;;  %v2849_v12 = vld [vmem:[%s4749_s3 + $0xf8] sm:$0xff] }
 0x1aa   : > { %4752 = vst [vmem:[#allocation2_spill] sm:$0xff] %v4240_v63  ;;  %v2071_v47 = vpop.f32.mrb[4].mxu0  ;;  %v2148_v48 = vmax.f32 %v3004_v22, 0.0  ;;  %v2133_v16 = vmax.f32 %v2971_v11, 0.0  ;;  %v2113_v18 = vpop.f32.mrb[33].mxu1  ;;  %v3010_v24 = vadd.f32 %v4115_v21, %v2111_v13  ;;  %v2905_v21 = vld [vmem:[%s4749_s3 + $0x2b8] sm:$0xff]  ;;  %v4286_v53 = vmul.f32 %v2863_v0, %v2147_v36 }
 0x1ab   : > { %4753 = vst [vmem:[#allocation3_spill] sm:$0xff] %v4260_v5  ;;  %v2073_v17 = vpop.f32.mrb[5].mxu0  ;;  %v2973_v23 = vadd.f32 %v4147_v3, %v2071_v47  ;;  %v4275_v20 = vadd.f32 %v4118_v25, %v2113_v18  ;;  %v2115_v29 = vpop.f32.mrb[34].mxu1  ;;  %v2188_v30 = vmul.f32 %v2160_v2, %v2132_v15  ;;  %v2283_v31 = vmul.f32 %v2848_v7, %v2132_v15  ;;  %v2877_v3 = vld [vmem:[%s4749_s3 + $0x1d8] sm:$0xff]  ;;  %v2864_v7 = vld [vmem:[%s4749_s3 + $0x170] sm:$0xff] }
 0x1ac   : > { %v2975_v26 = vadd.f32 %v4151_v4, %v2073_v17  ;;  %v2075_v22 = vpop.f32.mrb[6].mxu0  ;;  %v2378_v11 = vmul.f32 %v2876_v8, %v2132_v15  ;;  %v2473_v35 = vmul.f32 %v2904_v10, %v2132_v15  ;;  %v2117_v4 = vpop.f32.mrb[35].mxu1  ;;  %4754 = vst [vmem:[#allocation4_spill] sm:$0xff] %v4286_v53  ;;  %v4288_v56 = vmul.f32 %v2891_v1, %v2147_v36  ;;  %v2892_v8 = vld [vmem:[%s4749_s3 + $0x250] sm:$0xff] }
 0x1ad   : > { %v2077_v25 = vpop.f32.mrb[7].mxu0  ;;  %v4290_v2 = vmul.f32 %v2919_v14, %v2147_v36  ;;  %v2920_v10 = vld [vmem:[%s4749_s3 + $0x330] sm:$0xff]  ;;  %v2149_v47 = vmax.f32 %v3007_v32, 0.0  ;;  %v2214_v13 = vadd.f32 %v2188_v30, %v2186_v49  ;;  %v2309_v0 = vadd.f32 %v2283_v31, %v2281_v54  ;;  %v2865_v32 = vld [vmem:[%s4749_s3 + $0x178] sm:$0xff]  ;;  %v2162_v54 = vld [vmem:[%s4749_s3 + $0x20] sm:$0xff] }
 0x1ae   : > { %4755 = vst [vmem:[#allocation5_spill] sm:$0xff] %v4288_v56  ;;  %v2404_v15 = vadd.f32 %v2378_v11, %v2376_v59  ;;  %v2499_v1 = vadd.f32 %v2473_v35, %v2471_v51  ;;  %v2189_v17 = vmul.f32 %v2161_v19, %v2133_v16  ;;  %v2284_v36 = vmul.f32 %v2849_v12, %v2133_v16  ;;  %v2893_v49 = vld [vmem:[%s4749_s3 + $0x258] sm:$0xff]  ;;  %v2878_v19 = vld [vmem:[%s4749_s3 + $0x1e0] sm:$0xff] }
 0x1af   : > { %4756 = vst [vmem:[#allocation6_spill] sm:$0xff] %v4290_v2  ;;  %v2379_v14 = vmul.f32 %v2877_v3, %v2133_v16  ;;  %v2474_v18 = vmul.f32 %v2905_v21, %v2133_v16  ;;  %v2177_v2 = vld [vmem:[%s4749_s3 + $0x98] sm:$0xff]  ;;  %v4304_v56 = vmul.f32 %v2176_v50, %v2148_v48  ;;  %v4306_v53 = vmul.f32 %v2864_v7, %v2148_v48  ;;  %v2906_v30 = vld [vmem:[%s4749_s3 + $0x2c0] sm:$0xff]  ;;  %v2163_v7 = vld [vmem:[%s4749_s3 + $0x28] sm:$0xff] }
 0x1b0   : > { %v4308_v5 = vmul.f32 %v2892_v8, %v2148_v48  ;;  %v4310_v63 = vmul.f32 %v2920_v10, %v2148_v48  ;;  %v2233_v59 = vadd.f32 %v2189_v17, %v2187_v40  ;;  %v2328_v51 = vadd.f32 %v2284_v36, %v2282_v6  ;;  %v2850_v48 = vld [vmem:[%s4749_s3 + $0x100] sm:$0xff]  ;;  %v2921_v6 = vld [vmem:[%s4749_s3 + $0x338] sm:$0xff] }
 0x1b1   : > { %4757 = vst [vmem:[#allocation7_spill] sm:$0xff] %v4304_v56  ;;  %4758 = vst [vmem:[#allocation8_spill] sm:$0xff] %v4306_v53  ;;  %v2423_v16 = vadd.f32 %v2379_v14, %v2377_v43  ;;  %v2518_v50 = vadd.f32 %v2474_v18, %v2472_v44  ;;  %v4332_v11 = vpop.f32.mrb[36].mxu1  ;;  %v4334_v40 = vmul.f32 %v2177_v2, %v2149_v47  ;;  %v2134_v43 = vmax.f32 %v2973_v23, 0.0  ;;  %v2178_v21 = vld [vmem:[%s4749_s3 + $0xa0] sm:$0xff] }
 0x1b2   : > { %4759 = vst [vmem:[#allocation9_spill] sm:$0xff] %v4308_v5  ;;  %4760 = vst [vmem:[#allocation10_spill] sm:$0xff] %v4310_v63  ;;  %v4330_v31 = vpop.f32.mrb[8].mxu0  ;;  %v2150_v44 = vmax.f32 %v3010_v24, 0.0  ;;  %v2135_v35 = vmax.f32 %v2975_v26, 0.0  ;;  %v2123_v3 = vpop.f32.mrb[37].mxu1  ;;  %v2977_v2 = vadd.f32 %v4155_v38, %v2075_v22  ;;  %v3016_v8 = vadd.f32 %v4121_v27, %v2115_v29 }
 0x1b3   : > { %4761 = vst [vmem:[#allocation11_spill] sm:$0xff] %v4334_v40  ;;  %v2083_v12 = vpop.f32.mrb[9].mxu0  ;;  %v2979_v10 = vadd.f32 %v4159_v39, %v2077_v25  ;;  %v4349_v23 = vadd.f32 %v4123_v28, %v2117_v4  ;;  %v4353_v26 = vpop.f32.mrb[38].mxu1  ;;  %v2190_v17 = vmul.f32 %v2162_v54, %v2134_v43  ;;  %v2285_v36 = vmul.f32 %v2850_v48, %v2134_v43  ;;  %v2851_v40 = vld [vmem:[%s4749_s3 + $0x108] sm:$0xff]  ;;  %v2866_v4 = vld [vmem:[%s4749_s3 + $0x180] sm:$0xff] }
 0x1b4   : > { %v4351_v24 = vpop.f32.mrb[10].mxu0  ;;  %v2380_v14 = vmul.f32 %v2878_v19, %v2134_v43  ;;  %v2475_v18 = vmul.f32 %v2906_v30, %v2134_v43  ;;  %v2879_v27 = vld [vmem:[%s4749_s3 + $0x1e8] sm:$0xff]  ;;  %v4366_v39 = vpop.f32.mrb[39].mxu1  ;;  %v4368_v22 = vmul.f32 %v2865_v32, %v2149_v47  ;;  %v4370_v29 = vmul.f32 %v2893_v49, %v2149_v47  ;;  %v2894_v54 = vld [vmem:[%s4749_s3 + $0x260] sm:$0xff] }
 0x1b5   : > { %v2907_v28 = vld [vmem:[%s4749_s3 + $0x2c8] sm:$0xff]  ;;  %v4364_v38 = vpop.f32.mrb[11].mxu0  ;;  %v4372_v25 = vmul.f32 %v2921_v6, %v2149_v47  ;;  %v2922_v48 = vld [vmem:[%s4749_s3 + $0x340] sm:$0xff]  ;;  %v2151_v19 = vmax.f32 %v4275_v20, 0.0  ;;  %v2215_v32 = vadd.f32 %v2214_v13, %v2190_v17  ;;  %v2310_v30 = vadd.f32 %v2309_v0, %v2285_v36  ;;  %v2164_v13 = vld [vmem:[%s4749_s3 + $0x30] sm:$0xff] }
 0x1b6   : > { %4762 = vst [vmem:[#allocation12_spill] sm:$0xff] %v4368_v22  ;;  %4763 = vst [vmem:[#allocation13_spill] sm:$0xff] %v4370_v29  ;;  %v2405_v49 = vadd.f32 %v2404_v15, %v2380_v14  ;;  %v2500_v43 = vadd.f32 %v2499_v1, %v2475_v18  ;;  %v2191_v47 = vmul.f32 %v2163_v7, %v2135_v35  ;;  %v2179_v22 = vld [vmem:[%s4749_s3 + $0xa8] sm:$0xff]  ;;  %v2137_v36 = vmax.f32 %v2979_v10, 0.0  ;;  %v2180_v18 = vld [vmem:[%s4749_s3 + $0xb0] sm:$0xff] }
 0x1b7   : > { %4764 = vst [vmem:[#allocation14_spill] sm:$0xff] %v4372_v25  ;;  %v2286_v6 = vmul.f32 %v2851_v40, %v2135_v35  ;;  %v2381_v25 = vmul.f32 %v2879_v27, %v2135_v35  ;;  %v2476_v29 = vmul.f32 %v2907_v28, %v2135_v35  ;;  %v4387_v63 = vmul.f32 %v2178_v21, %v2150_v44  ;;  %v2867_v20 = vld [vmem:[%s4749_s3 + $0x188] sm:$0xff]  ;;  %v2852_v35 = vld [vmem:[%s4749_s3 + $0x110] sm:$0xff]  ;;  %v2165_v27 = vld [vmem:[%s4749_s3 + $0x38] sm:$0xff] }
 0x1b8   : > { %v4389_v5 = vmul.f32 %v2866_v4, %v2150_v44  ;;  %v4391_v53 = vmul.f32 %v2894_v54, %v2150_v44  ;;  %v4393_v56 = vmul.f32 %v2922_v48, %v2150_v44  ;;  %v2234_v0 = vadd.f32 %v2233_v59, %v2191_v47  ;;  %v2880_v44 = vld [vmem:[%s4749_s3 + $0x1f0] sm:$0xff]  ;;  %v2895_v59 = vld [vmem:[%s4749_s3 + $0x268] sm:$0xff]  ;;  %v2853_v48 = vld [vmem:[%s4749_s3 + $0x118] sm:$0xff] }
 0x1b9   : > { %v2329_v15 = vadd.f32 %v2328_v51, %v2286_v6  ;;  %v2424_v1 = vadd.f32 %v2423_v16, %v2381_v25  ;;  %v2519_v40 = vadd.f32 %v2518_v50, %v2476_v29  ;;  %v2908_v21 = vld [vmem:[%s4749_s3 + $0x2d0] sm:$0xff]  ;;  %v4412_v17 = vmul.f32 %v2179_v22, %v2151_v19  ;;  %v2923_v51 = vld [vmem:[%s4749_s3 + $0x348] sm:$0xff] }
 0x1ba   : > { %v4410_v7 = vpop.f32.mrb[12].mxu0  ;;  %v2136_v16 = vmax.f32 %v2977_v2, 0.0  ;;  %v2152_v50 = vmax.f32 %v3016_v8, 0.0  ;;  %v2981_v28 = vadd.f32 %v4163_v41, %v4330_v31  ;;  %v3022_v22 = vadd.f32 %v4127_v37, %v4332_v11  ;;  %v2881_v41 = vld [vmem:[%s4749_s3 + $0x1f8] sm:$0xff]  ;;  %v2924_v47 = vld [vmem:[%s4749_s3 + $0x350] sm:$0xff] }
 0x1bb   : > { %4765 = vst [vmem:[#allocation15_spill] sm:$0xff] %v4412_v17  ;;  %v4420_v14 = vpop.f32.mrb[13].mxu0  ;;  %v2983_v2 = vadd.f32 %v4167_v42, %v2083_v12  ;;  %v4434_v8 = vadd.f32 %v4130_v57, %v2123_v3  ;;  %v2909_v37 = vld [vmem:[%s4749_s3 + $0x2d8] sm:$0xff]  ;;  %v4449_v42 = vmul.f32 %v2867_v20, %v2151_v19  ;;  %v4451_v31 = vmul.f32 %v2895_v59, %v2151_v19  ;;  %v2868_v12 = vld [vmem:[%s4749_s3 + $0x190] sm:$0xff] }
 0x1bc   : > { %v4436_v10 = vpop.f32.mrb[14].mxu0  ;;  %v2192_v29 = vmul.f32 %v2164_v13, %v2136_v16  ;;  %v2287_v25 = vmul.f32 %v2852_v35, %v2136_v16  ;;  %v2382_v4 = vmul.f32 %v2880_v44, %v2136_v16  ;;  %v2477_v54 = vmul.f32 %v2908_v21, %v2136_v16  ;;  %v2896_v3 = vld [vmem:[%s4749_s3 + $0x270] sm:$0xff]  ;;  %v2181_v16 = vld [vmem:[%s4749_s3 + $0xb8] sm:$0xff] }
 0x1bd   : > { %v4447_v57 = vpop.f32.mrb[15].mxu0  ;;  %4766 = vst [vmem:[#allocation16_spill] sm:$0xff] %v4449_v42  ;;  %4767 = vst [vmem:[#allocation17_spill] sm:$0xff] %v4451_v31  ;;  %v4453_v11 = vmul.f32 %v2923_v51, %v2151_v19  ;;  %v2153_v6 = vmax.f32 %v4349_v23, 0.0  ;;  %v2193_v19 = vmul.f32 %v2165_v27, %v2137_v36  ;;  %v2288_v21 = vmul.f32 %v2853_v48, %v2137_v36  ;;  %v2166_v23 = vld [vmem:[%s4749_s3 + $0x40] sm:$0xff] }
 0x1be   : > { %v2216_v20 = vadd.f32 %v2215_v32, %v2192_v29  ;;  %v2311_v13 = vadd.f32 %v2310_v30, %v2287_v25  ;;  %v2406_v35 = vadd.f32 %v2405_v49, %v2382_v4  ;;  %v2501_v44 = vadd.f32 %v2500_v43, %v2477_v54  ;;  %v2182_v4 = vld [vmem:[%s4749_s3 + $0xc0] sm:$0xff]  ;;  %v2167_v54 = vld [vmem:[%s4749_s3 + $0x48] sm:$0xff] }
 0x1bf   : > { %4768 = vst [vmem:[#allocation18_spill] sm:$0xff] %v4453_v11  ;;  %v2383_v59 = vmul.f32 %v2881_v41, %v2137_v36  ;;  %v2478_v51 = vmul.f32 %v2909_v37, %v2137_v36  ;;  %v4468_v11 = vmul.f32 %v2180_v18, %v2152_v50  ;;  %v4470_v31 = vmul.f32 %v2868_v12, %v2152_v50  ;;  %v2854_v36 = vld [vmem:[%s4749_s3 + $0x120] sm:$0xff] }
 0x1c0   : > { %v4472_v42 = vmul.f32 %v2896_v3, %v2152_v50  ;;  %v4474_v17 = vmul.f32 %v2924_v47, %v2152_v50  ;;  %v2235_v32 = vadd.f32 %v2234_v0, %v2193_v19  ;;  %v2330_v30 = vadd.f32 %v2329_v15, %v2288_v21  ;;  %v2882_v18 = vld [vmem:[%s4749_s3 + $0x200] sm:$0xff]  ;;  %v2869_v0 = vld [vmem:[%s4749_s3 + $0x198] sm:$0xff]  ;;  %v2855_v47 = vld [vmem:[%s4749_s3 + $0x128] sm:$0xff] }
 0x1c1   : > { %v2425_v49 = vadd.f32 %v2424_v1, %v2383_v59  ;;  %v2520_v43 = vadd.f32 %v2519_v40, %v2478_v51  ;;  %v2910_v50 = vld [vmem:[%s4749_s3 + $0x2e0] sm:$0xff]  ;;  %v4488_v27 = vmul.f32 %v2181_v16, %v2153_v6  ;;  %v2897_v15 = vld [vmem:[%s4749_s3 + $0x278] sm:$0xff]  ;;  %v2138_v40 = vmax.f32 %v2981_v28, 0.0 }
 0x1c2   : > { %v2925_v1 = vld [vmem:[%s4749_s3 + $0x358] sm:$0xff]  ;;  %v2154_v29 = vmax.f32 %v3022_v22, 0.0  ;;  %v2139_v25 = vmax.f32 %v2983_v2, 0.0  ;;  %v2985_v48 = vadd.f32 %v4174_v45, %v4351_v24  ;;  %v3028_v41 = vadd.f32 %v4133_v61, %v4353_v26  ;;  %v2883_v45 = vld [vmem:[%s4749_s3 + $0x208] sm:$0xff]  ;;  %v2870_v26 = vld [vmem:[%s4749_s3 + $0x1a0] sm:$0xff] }
 0x1c3   : > { %v2987_v37 = vadd.f32 %v4178_v46, %v4364_v38  ;;  %v3031_v28 = vadd.f32 %v4135_v62, %v4366_v39  ;;  %v2194_v22 = vmul.f32 %v2166_v23, %v2138_v40  ;;  %v2289_v2 = vmul.f32 %v2854_v36, %v2138_v40  ;;  %v2911_v61 = vld [vmem:[%s4749_s3 + $0x2e8] sm:$0xff]  ;;  %v2898_v38 = vld [vmem:[%s4749_s3 + $0x280] sm:$0xff] }
 0x1c4   : > { %v2384_v12 = vmul.f32 %v2882_v18, %v2138_v40  ;;  %v2479_v3 = vmul.f32 %v2910_v50, %v2138_v40  ;;  %v4522_v46 = vmul.f32 %v2869_v0, %v2153_v6  ;;  %v4524_v24 = vmul.f32 %v2897_v15, %v2153_v6  ;;  %v2926_v39 = vld [vmem:[%s4749_s3 + $0x360] sm:$0xff]  ;;  %v2183_v50 = vld [vmem:[%s4749_s3 + $0xc8] sm:$0xff] }
 0x1c5   : > { %v4526_v62 = vmul.f32 %v2925_v1, %v2153_v6  ;;  %v2155_v19 = vmax.f32 %v4434_v8, 0.0  ;;  %v2217_v21 = vadd.f32 %v2216_v20, %v2194_v22  ;;  %v2312_v59 = vadd.f32 %v2311_v13, %v2289_v2  ;;  %v2168_v8 = vld [vmem:[%s4749_s3 + $0x50] sm:$0xff] }
 0x1c6   : > { %v2407_v51 = vadd.f32 %v2406_v35, %v2384_v12  ;;  %v2502_v16 = vadd.f32 %v2501_v44, %v2479_v3  ;;  %v2195_v6 = vmul.f32 %v2167_v54, %v2139_v25  ;;  %v2290_v23 = vmul.f32 %v2855_v47, %v2139_v25  ;;  %v2184_v12 = vld [vmem:[%s4749_s3 + $0xd0] sm:$0xff]  ;;  %v2169_v3 = vld [vmem:[%s4749_s3 + $0x58] sm:$0xff] }
 0x1c7   : > { %v2385_v36 = vmul.f32 %v2883_v45, %v2139_v25  ;;  %v2480_v18 = vmul.f32 %v2911_v61, %v2139_v25  ;;  %v4541_v0 = vmul.f32 %v2182_v4, %v2154_v29  ;;  %v4543_v15 = vmul.f32 %v2870_v26, %v2154_v29  ;;  %v2856_v25 = vld [vmem:[%s4749_s3 + $0x130] sm:$0xff] }
 0x1c8   : > { %v4545_v1 = vmul.f32 %v2898_v38, %v2154_v29  ;;  %v4547_v40 = vmul.f32 %v2926_v39, %v2154_v29  ;;  %v2236_v20 = vadd.f32 %v2235_v32, %v2195_v6  ;;  %v2331_v13 = vadd.f32 %v2330_v30, %v2290_v23  ;;  %v2884_v4 = vld [vmem:[%s4749_s3 + $0x210] sm:$0xff]  ;;  %v2871_v32 = vld [vmem:[%s4749_s3 + $0x1a8] sm:$0xff]  ;;  %v2857_v39 = vld [vmem:[%s4749_s3 + $0x138] sm:$0xff] }
 0x1c9   : > { %v2426_v35 = vadd.f32 %v2425_v49, %v2385_v36  ;;  %v2521_v44 = vadd.f32 %v2520_v43, %v2480_v18  ;;  %v2912_v29 = vld [vmem:[%s4749_s3 + $0x2f0] sm:$0xff]  ;;  %v4561_v54 = vmul.f32 %v2183_v50, %v2155_v19  ;;  %v2899_v30 = vld [vmem:[%s4749_s3 + $0x288] sm:$0xff]  ;;  %v2140_v43 = vmax.f32 %v2985_v48, 0.0 }
 0x1ca   : > { %v2927_v49 = vld [vmem:[%s4749_s3 + $0x368] sm:$0xff]  ;;  %v2156_v22 = vmax.f32 %v3028_v41, 0.0  ;;  %v2141_v2 = vmax.f32 %v2987_v37, 0.0  ;;  %v2989_v47 = vadd.f32 %v4198_v9, %v4410_v7  ;;  %v2991_v45 = vadd.f32 %v4212_v52, %v4420_v14  ;;  %v2885_v9 = vld [vmem:[%s4749_s3 + $0x218] sm:$0xff]  ;;  %v2872_v14 = vld [vmem:[%s4749_s3 + $0x1b0] sm:$0xff] }
 0x1cb   : > { %v2993_v61 = vadd.f32 %v4216_v33, %v4436_v10  ;;  %v2995_v48 = vadd.f32 %v4220_v34, %v4447_v57  ;;  %v2196_v41 = vmul.f32 %v2168_v8, %v2140_v43  ;;  %v2291_v37 = vmul.f32 %v2856_v25, %v2140_v43  ;;  %v2913_v52 = vld [vmem:[%s4749_s3 + $0x2f8] sm:$0xff]  ;;  %v2900_v10 = vld [vmem:[%s4749_s3 + $0x290] sm:$0xff] }
 0x1cc   : > { %v2386_v26 = vmul.f32 %v2884_v4, %v2140_v43  ;;  %v2481_v38 = vmul.f32 %v2912_v29, %v2140_v43  ;;  %v4595_v33 = vmul.f32 %v2871_v32, %v2155_v19  ;;  %v4597_v7 = vmul.f32 %v2899_v30, %v2155_v19  ;;  %v2928_v57 = vld [vmem:[%s4749_s3 + $0x370] sm:$0xff]  ;;  %v2185_v29 = vld [vmem:[%s4749_s3 + $0xd8] sm:$0xff]  ;;  %v2858_v43 = vld [vmem:[%s4749_s3 + $0x140] sm:$0xff] }
 0x1cd   : > { %v4599_v34 = vmul.f32 %v2927_v49, %v2155_v19  ;;  %v2157_v6 = vmax.f32 %v3031_v28, 0.0  ;;  %v2218_v23 = vadd.f32 %v2217_v21, %v2196_v41  ;;  %v2313_v36 = vadd.f32 %v2312_v59, %v2291_v37  ;;  %v2873_v32 = vld [vmem:[%s4749_s3 + $0x1b8] sm:$0xff]  ;;  %v2170_v49 = vld [vmem:[%s4749_s3 + $0x60] sm:$0xff] }
 0x1ce   : > { %v2408_v18 = vadd.f32 %v2407_v51, %v2386_v26  ;;  %v2503_v50 = vadd.f32 %v2502_v16, %v2481_v38  ;;  %v2197_v8 = vmul.f32 %v2169_v3, %v2141_v2  ;;  %v2292_v19 = vmul.f32 %v2857_v39, %v2141_v2  ;;  %v2901_v28 = vld [vmem:[%s4749_s3 + $0x298] sm:$0xff]  ;;  %v2914_v37 = vld [vmem:[%s4749_s3 + $0x300] sm:$0xff]  ;;  %v2171_v26 = vld [vmem:[%s4749_s3 + $0x68] sm:$0xff] }
 0x1cf   : > { %4769 = vst [vmem:[#allocation19_spill] sm:$0xff] %v4599_v34  ;;  %v2387_v25 = vmul.f32 %v2885_v9, %v2141_v2  ;;  %v2482_v4 = vmul.f32 %v2913_v52, %v2141_v2  ;;  %v4619_v21 = vmul.f32 %v2184_v12, %v2156_v22  ;;  %v4621_v59 = vmul.f32 %v2872_v14, %v2156_v22  ;;  %v2929_v30 = vld [vmem:[%s4749_s3 + $0x378] sm:$0xff]  ;;  %v2915_v9 = vld [vmem:[%s4749_s3 + $0x308] sm:$0xff] }
 0x1d0   : > { %v4623_v51 = vmul.f32 %v2900_v10, %v2156_v22  ;;  %v4625_v16 = vmul.f32 %v2928_v57, %v2156_v22  ;;  %v2237_v2 = vadd.f32 %v2236_v20, %v2197_v8  ;;  %v2332_v12 = vadd.f32 %v2331_v13, %v2292_v19  ;;  %v2886_v22 = vld [vmem:[%s4749_s3 + $0x220] sm:$0xff] }
 0x1d1   : > { %4770 = vst [vmem:[#allocation20_spill] sm:$0xff] %v4619_v21  ;;  %4771 = vst [vmem:[#allocation21_spill] sm:$0xff] %v4621_v59  ;;  %v2427_v3 = vadd.f32 %v2426_v35, %v2387_v25  ;;  %v2522_v41 = vadd.f32 %v2521_v44, %v2482_v4  ;;  %v4645_v38 = vmul.f32 %v2185_v29, %v2157_v6  ;;  %v2142_v20 = vmax.f32 %v2989_v47, 0.0  ;;  %v2859_v35 = vld [vmem:[%s4749_s3 + $0x148] sm:$0xff]  ;;  %v2172_v25 = vld [vmem:[%s4749_s3 + $0x70] sm:$0xff] }
 0x1d2   : > { %4772 = vst [vmem:[#allocation22_spill] sm:$0xff] %v4623_v51  ;;  %4773 = vst [vmem:[#allocation23_spill] sm:$0xff] %v4625_v16  ;;  %v4647_v39 = vmul.f32 %v2873_v32, %v2157_v6  ;;  %v2143_v13 = vmax.f32 %v2991_v45, 0.0  ;;  %v2887_v44 = vld [vmem:[%s4749_s3 + $0x228] sm:$0xff]  ;;  %v4658_v52 = vmul.f32 %v2901_v28, %v2157_v6  ;;  %v4660_v14 = vmul.f32 %v2929_v30, %v2157_v6  ;;  %v2860_v4 = vld [vmem:[%s4749_s3 + $0x150] sm:$0xff] }
 0x1d3   : > { %4774 = vst [vmem:[#allocation24_spill] sm:$0xff] %v4645_v38  ;;  %v2144_v10 = vmax.f32 %v2993_v61, 0.0  ;;  %v2145_v57 = vmax.f32 %v2995_v48, 0.0  ;;  %v2198_v47 = vmul.f32 %v2170_v49, %v2142_v20  ;;  %v2293_v45 = vmul.f32 %v2858_v43, %v2142_v20  ;;  %v2888_v61 = vld [vmem:[%s4749_s3 + $0x230] sm:$0xff]  ;;  %v2173_v6 = vld [vmem:[%s4749_s3 + $0x78] sm:$0xff] }
 0x1d4   : > { %4775 = vst [vmem:[#allocation25_spill] sm:$0xff] %v4647_v39  ;;  %4776 = vst [vmem:[#allocation26_spill] sm:$0xff] %v4658_v52  ;;  %v2388_v8 = vmul.f32 %v2886_v22, %v2142_v20  ;;  %v2483_v19 = vmul.f32 %v2914_v37, %v2142_v20  ;;  %v2199_v29 = vmul.f32 %v2171_v26, %v2143_v13  ;;  %v2916_v48 = vld [vmem:[%s4749_s3 + $0x310] sm:$0xff]  ;;  %v2861_v37 = vld [vmem:[%s4749_s3 + $0x158] sm:$0xff] }
 0x1d5   : > { %4777 = vst [vmem:[#allocation27_spill] sm:$0xff] %v4660_v14  ;;  %v2294_v32 = vmul.f32 %v2859_v35, %v2143_v13  ;;  %v2389_v28 = vmul.f32 %v2887_v44, %v2143_v13  ;;  %v2484_v52 = vmul.f32 %v2915_v9, %v2143_v13  ;;  %v2219_v30 = vadd.f32 %v2218_v23, %v2198_v47  ;;  %v2889_v26 = vld [vmem:[%s4749_s3 + $0x238] sm:$0xff] }
 0x1d6   : > { %v2314_v49 = vadd.f32 %v2313_v36, %v2293_v45  ;;  %v2409_v43 = vadd.f32 %v2408_v18, %v2388_v8  ;;  %v2504_v22 = vadd.f32 %v2503_v50, %v2483_v19  ;;  %v2917_v20 = vld [vmem:[%s4749_s3 + $0x318] sm:$0xff]  ;;  %v2238_v13 = vadd.f32 %v2237_v2, %v2199_v29 }
 0x1d7   : > { %v2333_v35 = vadd.f32 %v2332_v12, %v2294_v32  ;;  %v2428_v44 = vadd.f32 %v2427_v3, %v2389_v28  ;;  %v2523_v9 = vadd.f32 %v2522_v41, %v2484_v52  ;;  %v2200_v23 = vmul.f32 %v2172_v25, %v2144_v10  ;;  %v4778_v41 = vld [vmem:[#allocation2_spill] sm:$0xff]  ;;  %v4781_v29 = vld [vmem:[#allocation5_spill] sm:$0xff] }
 0x1d8   : > { %v2295_v36 = vmul.f32 %v2860_v4, %v2144_v10  ;;  %v2390_v18 = vmul.f32 %v2888_v61, %v2144_v10  ;;  %v2485_v50 = vmul.f32 %v2916_v48, %v2144_v10  ;;  %v2201_v47 = vmul.f32 %v2173_v6, %v2145_v57  ;;  %v4779_v10 = vld [vmem:[#allocation3_spill] sm:$0xff]  ;;  %v4780_v4 = vld [vmem:[#allocation4_spill] sm:$0xff]  ;;  %v4782_v28 = vld [vmem:[#allocation6_spill] sm:$0xff] }
 0x1d9   : > { %v2296_v45 = vmul.f32 %v2861_v37, %v2145_v57  ;;  %v2391_v8 = vmul.f32 %v2889_v26, %v2145_v57  ;;  %v2486_v19 = vmul.f32 %v2917_v20, %v2145_v57  ;;  %v2220_v14 = vadd.f32 %v2219_v30, %v2200_v23  ;;  %v4783_v48 = vld [vmem:[#allocation7_spill] sm:$0xff]  ;;  %v4784_v30 = vld [vmem:[#allocation8_spill] sm:$0xff]  ;;  %v4790_v37 = vld [vmem:[#allocation14_spill] sm:$0xff] }
 0x1da   : > { %v2315_v39 = vadd.f32 %v2314_v49, %v2295_v36  ;;  %v2410_v38 = vadd.f32 %v2409_v43, %v2390_v18  ;;  %v2505_v16 = vadd.f32 %v2504_v22, %v2485_v50  ;;  %v2239_v51 = vadd.f32 %v2238_v13, %v2201_v47  ;;  %v4785_v43 = vld [vmem:[#allocation9_spill] sm:$0xff]  ;;  %v4791_v13 = vld [vmem:[#allocation15_spill] sm:$0xff]  ;;  %v4794_v18 = vld [vmem:[#allocation18_spill] sm:$0xff] }
 0x1db   : > { %v2334_v59 = vadd.f32 %v2333_v35, %v2296_v45  ;;  %v2429_v21 = vadd.f32 %v2428_v44, %v2391_v8  ;;  %v2524_v34 = vadd.f32 %v2523_v9, %v2486_v19  ;;  %v2221_v2 = vadd.f32 %v2220_v14, %v4234_v60  ;;  %v4786_v14 = vld [vmem:[#allocation10_spill] sm:$0xff]  ;;  %v4789_v22 = vld [vmem:[#allocation13_spill] sm:$0xff]  ;;  %v4792_v44 = vld [vmem:[#allocation16_spill] sm:$0xff] }
 0x1dc   : > { %v2316_v12 = vadd.f32 %v2315_v39, %v4236_v55  ;;  %v2411_v3 = vadd.f32 %v2410_v38, %v4238_v58  ;;  %v2506_v52 = vadd.f32 %v2505_v16, %v4778_v41  ;;  %v2240_v25 = vadd.f32 %v2239_v51, %v4779_v10  ;;  %v4787_v39 = vld [vmem:[#allocation11_spill] sm:$0xff]  ;;  %v4788_v38 = vld [vmem:[#allocation12_spill] sm:$0xff]  ;;  %v4793_v23 = vld [vmem:[#allocation17_spill] sm:$0xff] }
 0x1dd   : > { %v2335_v57 = vadd.f32 %v2334_v59, %v4780_v4  ;;  %v2430_v32 = vadd.f32 %v2429_v21, %v4781_v29  ;;  %v2525_v61 = vadd.f32 %v2524_v34, %v4782_v28  ;;  %v2222_v6 = vadd.f32 %v2221_v2, %v4783_v48  ;;  %v4796_v41 = vld [vmem:[#allocation20_spill] sm:$0xff]  ;;  %v4798_v10 = vld [vmem:[#allocation22_spill] sm:$0xff] }
 0x1de   : > { %v2317_v49 = vadd.f32 %v2316_v12, %v4784_v30  ;;  %v2412_v60 = vadd.f32 %v2411_v3, %v4785_v43  ;;  %v2507_v55 = vadd.f32 %v2506_v52, %v4786_v14  ;;  %v2241_v58 = vadd.f32 %v2240_v25, %v4787_v39  ;;  %v4795_v3 = vld [vmem:[#allocation19_spill] sm:$0xff]  ;;  %v4797_v52 = vld [vmem:[#allocation21_spill] sm:$0xff]  ;;  %v4800_v4 = vld [vmem:[#allocation24_spill] sm:$0xff] }
 0x1df   : > { %v2336_v16 = vadd.f32 %v2335_v57, %v4788_v38  ;;  %v2431_v51 = vadd.f32 %v2430_v32, %v4789_v22  ;;  %v2526_v59 = vadd.f32 %v2525_v61, %v4790_v37  ;;  %v2223_v21 = vadd.f32 %v2222_v6, %v4387_v63  ;;  %v4799_v25 = vld [vmem:[#allocation23_spill] sm:$0xff]  ;;  %v4801_v57 = vld [vmem:[#allocation25_spill] sm:$0xff]  ;;  %v4802_v29 = vld [vmem:[#allocation26_spill] sm:$0xff] }
 0x1e0   : > { %v2318_v34 = vadd.f32 %v2317_v49, %v4389_v5  ;;  %v2413_v26 = vadd.f32 %v2412_v60, %v4391_v53  ;;  %v2508_v20 = vadd.f32 %v2507_v55, %v4393_v56  ;;  %v2242_v35 = vadd.f32 %v2241_v58, %v4791_v13  ;;  %v4803_v32 = vld [vmem:[#allocation27_spill] sm:$0xff] }
 0x1e1   : > { %v2337_v9 = vadd.f32 %v2336_v16, %v4792_v44  ;;  %v2432_v36 = vadd.f32 %v2431_v51, %v4793_v23  ;;  %v2527_v50 = vadd.f32 %v2526_v59, %v4794_v18  ;;  %v2224_v47 = vadd.f32 %v2223_v21, %v4468_v11 }
 0x1e2   : > { %v2319_v45 = vadd.f32 %v2318_v34, %v4470_v31  ;;  %v2414_v63 = vadd.f32 %v2413_v26, %v4472_v42  ;;  %v2509_v5 = vadd.f32 %v2508_v20, %v4474_v17  ;;  %v2243_v53 = vadd.f32 %v2242_v35, %v4488_v27 }
 0x1e3   : > { %v2338_v56 = vadd.f32 %v2337_v9, %v4522_v46  ;;  %v2433_v8 = vadd.f32 %v2432_v36, %v4524_v24  ;;  %v2528_v19 = vadd.f32 %v2527_v50, %v4526_v62  ;;  %v2225_v2 = vadd.f32 %v2224_v47, %v4541_v0 }
 0x1e4   : > { %v2320_v12 = vadd.f32 %v2319_v45, %v4543_v15  ;;  %v2415_v11 = vadd.f32 %v2414_v63, %v4545_v1  ;;  %v2510_v31 = vadd.f32 %v2509_v5, %v4547_v40  ;;  %v2244_v42 = vadd.f32 %v2243_v53, %v4561_v54 }
 0x1e5   : > { %v2339_v17 = vadd.f32 %v2338_v56, %v4595_v33  ;;  %v2434_v27 = vadd.f32 %v2433_v8, %v4597_v7  ;;  %v2529_v46 = vadd.f32 %v2528_v19, %v4795_v3  ;;  %v2226_v24 = vadd.f32 %v2225_v2, %v4796_v41 }
 0x1e6   : > { %v2321_v62 = vadd.f32 %v2320_v12, %v4797_v52  ;;  %v2416_v0 = vadd.f32 %v2415_v11, %v4798_v10  ;;  %v2511_v15 = vadd.f32 %v2510_v31, %v4799_v25  ;;  %v2245_v1 = vadd.f32 %v2244_v42, %v4800_v4 }
 0x1e7   : > { %v2340_v40 = vadd.f32 %v2339_v17, %v4801_v57  ;;  %v2435_v54 = vadd.f32 %v2434_v27, %v4802_v29  ;;  %v2530_v33 = vadd.f32 %v2529_v46, %v4803_v32  ;;  %v2227_v28 = vrot.slane %v2226_v24, 4 }
 0x1e8   : > { %v2322_v7 = vrot.slane %v2321_v62, 4  ;;  %v2417_v61 = vrot.slane %v2416_v0, 4  ;;  %v2512_v48 = vrot.slane %v2511_v15, 4  ;;  %v2246_v6 = vrot.slane %v2245_v1, 4 }
 0x1e9   : > { %v2341_v30 = vrot.slane %v2340_v40, 4  ;;  %v2436_v49 = vrot.slane %v2435_v54, 4  ;;  %v2531_v43 = vrot.slane %v2530_v33, 4  ;;  %v2228_v60 = vadd.f32 %v2227_v28, %v2226_v24 }
 0x1ea   : > { %v2323_v14 = vadd.f32 %v2322_v7, %v2321_v62  ;;  %v2418_v55 = vadd.f32 %v2417_v61, %v2416_v0  ;;  %v2513_v39 = vadd.f32 %v2512_v48, %v2511_v15  ;;  %v2247_v58 = vadd.f32 %v2246_v6, %v2245_v1  ;;  %v2552_v1 = vld [vmem:[%s4750_s4] sm:$0xf] }
 0x1eb   : > { %v2342_v38 = vadd.f32 %v2341_v30, %v2340_v40  ;;  %v2437_v16 = vadd.f32 %v2436_v49, %v2435_v54  ;;  %v2532_v22 = vadd.f32 %v2531_v43, %v2530_v33  ;;  %v2229_v51 = vrot.slane %v2228_v60, 2 }
 0x1ec   : > { %v2324_v37 = vrot.slane %v2323_v14, 2  ;;  %v2419_v59 = vrot.slane %v2418_v55, 2  ;;  %v2514_v21 = vrot.slane %v2513_v39, 2  ;;  %v2248_v34 = vrot.slane %v2247_v58, 2 }
 0x1ed   : > { %v2343_v26 = vrot.slane %v2342_v38, 2  ;;  %v2438_v20 = vrot.slane %v2437_v16, 2  ;;  %v2533_v13 = vrot.slane %v2532_v22, 2  ;;  %v2230_v35 = vadd.f32 %v2229_v51, %v2228_v60 }
 0x1ee   : > { %v2325_v44 = vadd.f32 %v2324_v37, %v2323_v14  ;;  %v2420_v9 = vadd.f32 %v2419_v59, %v2418_v55  ;;  %v2515_v23 = vadd.f32 %v2514_v21, %v2513_v39  ;;  %v2249_v36 = vadd.f32 %v2248_v34, %v2247_v58 }
 0x1ef   : > { %v2344_v18 = vadd.f32 %v2343_v26, %v2342_v38  ;;  %v2439_v50 = vadd.f32 %v2438_v20, %v2437_v16  ;;  %v2534_v47 = vadd.f32 %v2533_v13, %v2532_v22  ;;  %v2231_v45 = vrot.slane %v2230_v35, 1 }
 0x1f0   : > { %v2326_v63 = vrot.slane %v2325_v44, 1  ;;  %v2421_v5 = vrot.slane %v2420_v9, 1  ;;  %v2516_v53 = vrot.slane %v2515_v23, 1  ;;  %v2250_v56 = vrot.slane %v2249_v36, 1 }
 0x1f1   : > { %v2345_v8 = vrot.slane %v2344_v18, 1  ;;  %v2440_v19 = vrot.slane %v2439_v50, 1  ;;  %v2535_v2 = vrot.slane %v2534_v47, 1  ;;  %v2232_v12 = vadd.f32 %v2231_v45, %v2230_v35 }
 0x1f2   : > { %v2327_v11 = vadd.f32 %v2326_v63, %v2325_v44  ;;  %v2422_v31 = vadd.f32 %v2421_v5, %v2420_v9  ;;  %v2251_v42 = vadd.f32 %v2250_v56, %v2249_v36  ;;  %v2517_v3 = vadd.f32 %v2516_v53, %v2515_v23 }
 0x1f3   : > { %v2346_v17 = vadd.f32 %v2345_v8, %v2344_v18  ;;  %v2441_v27 = vadd.f32 %v2440_v19, %v2439_v50  ;;  %v2536_v41 = vadd.f32 %v2535_v2, %v2534_v47 }
 0x1f4   : > { %v2538_v46 = vsel %vm2537_vm0, %v2232_v12, %v2327_v11 }
 0x1f5   : > { %v2539_v24 = vsel %vm2537_vm0, %v2251_v42, %v2346_v17  ;;  %v2541_v52 = vsel %vm2540_vm1, %v2538_v46, %v2422_v31 }
 0x1f6   : > { %v2542_v62 = vsel %vm2540_vm1, %v2539_v24, %v2441_v27  ;;  %v2544_v10 = vsel %vm2543_vm2, %v2541_v52, %v2517_v3 }
 0x1f7   : > { %v2545_v0 = vsel %vm2543_vm2, %v2542_v62, %v2536_v41  ;;  %v2547_v25 = vsel %vm2546_vm3, %v2544_v10, 0.0 }
 0x1f8   : > { %v2548_v15 = vsel %vm2546_vm3, %v2545_v0, 0.0 }
 0x1f9   : > { %v2549_v4 = vadd.f32 %v2548_v15, %v2547_v25 }
 0x1fb   : > { %2550 = vadd.xlane.f32.xlu0 %v2549_v4 }
 0x288   : > { %v2551_v57 = vpop.xlane.xlu0 %2550 }
 0x289   : > { %v2553_v40 = vadd.f32 %v2552_v1, %v2551_v57 }
 0x28b   : > { %2555 = vst.msk [vmem:[%s222_s7] sm:$0xf] %vm2554_vm4, %v2553_v40 }
 0x28c PF: > { %s15_s18 = sadd.s32 1, %s3464_s18  }
 0x28d   : > { %p12_p4 = scmp.ge.s32.totalorder %s15_s18, 4  }
 0x28f   :  { %14 = sbr.rel (!%p12_p4) target bundleno = 1 (0x1), region = 73 }

</bundles_post_ra>
